<compile_context>
chip_gen: v7x
topology: tpu7x:2x2x1
jax: 0.10.0
libtpu: 0.0.40
codegen_flags: <defaults>
</compile_context>

<pallas_src>
import jax
import jax.numpy as jnp
from jax import lax
from jax.experimental import pallas as pl
from jax.experimental.pallas import tpu as pltpu

# Problem sizes (small, consistent with the module's forward).
B, S, D = 2, 128, 32          # batch, sequence length, config.input_dim
N_SENT = 8                    # number of sentences (last dim of all_mapping)
T_LABEL = 4                   # config.label_type_num
BAND = 15                     # np.tril(np.triu(ones(S,S), 0), 15): 0 <= j - i <= 15
NEG = 1e30
FILL = -3.0e38                # below any legal score (scores are >= ~-3e30)

assert D >= 3 + T_LABEL, "packed bias row must fit in the param width"


def _support_kernel(x_ref, masks_ref, amap_ref, wb_ref,
                    start_ref, end_ref, type_ref, sp_ref, spos_ref, epos_ref):
    x = x_ref[...]                       # (B, D, S)   S on the lane axis
    masks = masks_ref[...]               # (B, 2, S)   row0 = context_mask, row1 = query_mapping
    wb = wb_ref[...]                     # (8 + D, D)  packed parameters

    ctx = masks[:, 0, :]                 # (B, S)
    qmap = masks[:, 1, :]                # (B, S)

    w_tok = wb[0:2, :]                   # (2, D): rows [w_start ; w_end]
    w_sp = wb[2:3, :]                    # (1, D)
    bias = wb[3:4, :]                    # (1, D): [b_start, b_end, b_sp, b_type...]
    w_type = wb[8:8 + D, 0:T_LABEL]      # (D, T)
    b_start = bias[:, 0:1]
    b_end = bias[:, 1:2]
    b_sp = bias[:, 2:3]
    b_type = bias[:, 3:3 + T_LABEL]      # (1, T)

    # ---- start / end logits: ONE batched MXU matmul over the fused weight rows.
    w_tok_b = jnp.broadcast_to(w_tok[None], (B, 2, D))
    proj = jnp.einsum('bkd,bds->bks', w_tok_b, x,
                      preferred_element_type=jnp.float32)           # (B, 2, S)
    ctx_pen = NEG * (1.0 - ctx)
    start_logits = proj[:, 0, :] + b_start - ctx_pen                # (B, S)
    end_logits = proj[:, 1, :] + b_end - ctx_pen                    # (B, S)
    start_ref[...] = start_logits
    end_ref[...] = end_logits

    # ---- supporting-fact logits: masked max over S for ALL sentences at once,
    # then a lane reduce against w_sp -> a single lane-contiguous (B, N) store.
    # (mask-multiply-before-max matches the PyTorch reference semantics.)
    amap = amap_ref[...]                                            # (B, N, 1, S)
    sp_state = jnp.max(amap * x[:, None, :, :], axis=-1)            # (B, N, D)
    sp_ref[...] = jnp.sum(sp_state * w_sp[None], axis=-1) + b_sp    # (B, N)

    # ---- answer-type logits: global max-pool over S, tiny rank-2 matmul.
    type_state = jnp.max(x, axis=-1)                                # (B, D)
    type_ref[...] = jnp.dot(type_state, w_type,
                            preferred_element_type=jnp.float32) + b_type

    # ---- span scores WITHOUT materializing the (B, S, S) outer tensor.
    # outer[b,i,j] = start[b,i] + end[b,j] - NEG*(1-band[i,j]) - NEG*qmap[b,i],
    # band = {0 <= j - i <= BAND}.  Row / column maxima therefore reduce to
    # sliding-window maxima of width BAND+1, computed with log2(BAND+1) lane
    # rotations.  This matches the materialized formulation whenever at least
    # one in-band position survives the masks (j = i is always in band; the
    # fully-degenerate case only reorders scores that are already <= -1e30).
    lane = lax.broadcasted_iota(jnp.int32, (B, S), 1)

    def window_max_fwd(v):
        # y[:, i] = max_{j in [i, min(i+BAND, S-1)]} v[:, j]
        acc, cov = v, 1
        while cov < BAND + 1:
            step = min(cov, BAND + 1 - cov)
            rolled = pltpu.roll(acc, shift=S - step, axis=1)        # acc[:, i+step]
            acc = jnp.maximum(acc, jnp.where(lane < S - step, rolled, FILL))
            cov += step
        return acc

    def window_max_bwd(v):
        # y[:, j] = max_{i in [max(j-BAND, 0), j]} v[:, i]
        acc, cov = v, 1
        while cov < BAND + 1:
            step = min(cov, BAND + 1 - cov)
            rolled = pltpu.roll(acc, shift=step, axis=1)            # acc[:, i-step]
            acc = jnp.maximum(acc, jnp.where(lane >= step, rolled, FILL))
            cov += step
        return acc

    row_max = start_logits + window_max_fwd(end_logits) - NEG * qmap      # (B, S)
    col_max = end_logits + window_max_bwd(start_logits - NEG * qmap)      # (B, S)

    # argmax (first occurrence) = min index achieving the max.
    rbest = jnp.max(row_max, axis=1, keepdims=True)
    spos_ref[...] = jnp.min(jnp.where(row_max == rbest, lane, S),
                            axis=1, keepdims=True).astype(jnp.int32)
    cbest = jnp.max(col_max, axis=1, keepdims=True)
    epos_ref[...] = jnp.min(jnp.where(col_max == cbest, lane, S),
                            axis=1, keepdims=True).astype(jnp.int32)


def make_params(key):
    ks = jax.random.split(key, 8)
    scale = 0.02
    return {
        "w_start": scale * jax.random.normal(ks[0], (1, D), jnp.float32),
        "b_start": scale * jax.random.normal(ks[1], (1, 1), jnp.float32),
        "w_end": scale * jax.random.normal(ks[2], (1, D), jnp.float32),
        "b_end": scale * jax.random.normal(ks[3], (1, 1), jnp.float32),
        "w_sp": scale * jax.random.normal(ks[4], (1, D), jnp.float32),
        "b_sp": scale * jax.random.normal(ks[5], (1, 1), jnp.float32),
        "w_type": scale * jax.random.normal(ks[6], (D, T_LABEL), jnp.float32),
        "b_type": scale * jax.random.normal(ks[7], (1, T_LABEL), jnp.float32),
    }


def _pack_params(params):
    """Pack all weights/biases into one (8 + D, D) f32 array (one DMA)."""
    wb = jnp.zeros((8 + D, D), jnp.float32)
    wb = wb.at[0, :].set(params["w_start"][0])
    wb = wb.at[1, :].set(params["w_end"][0])
    wb = wb.at[2, :].set(params["w_sp"][0])
    wb = wb.at[3, 0].set(params["b_start"][0, 0])
    wb = wb.at[3, 1].set(params["b_end"][0, 0])
    wb = wb.at[3, 2].set(params["b_sp"][0, 0])
    wb = wb.at[3, 3:3 + T_LABEL].set(params["b_type"][0])
    wb = wb.at[8:8 + D, 0:T_LABEL].set(params["w_type"])
    return wb


@jax.jit
def support_net_forward(context_encoding, context_mask, query_mapping,
                        all_mapping, params):
    # Layout plumbing (host/XLA side, free at these sizes): put S on the lane
    # axis and consolidate the inputs down to 4 arrays.
    x_t = jnp.transpose(context_encoding, (0, 2, 1))                 # (B, D, S)
    masks = jnp.stack([context_mask, query_mapping], axis=1)         # (B, 2, S)
    amap4 = jnp.transpose(all_mapping, (0, 2, 1))[:, :, None, :]     # (B, N, 1, S)
    wb = _pack_params(params)                                        # (8 + D, D)

    vmem = pl.BlockSpec(memory_space=pltpu.MemorySpace.VMEM)
    outs = pl.pallas_call(
        _support_kernel,
        out_shape=(
            jax.ShapeDtypeStruct((B, S), jnp.float32),         # start_logits
            jax.ShapeDtypeStruct((B, S), jnp.float32),         # end_logits
            jax.ShapeDtypeStruct((B, T_LABEL), jnp.float32),   # type_logits
            jax.ShapeDtypeStruct((B, N_SENT), jnp.float32),    # sp_logits
            jax.ShapeDtypeStruct((B, 1), jnp.int32),           # start_position
            jax.ShapeDtypeStruct((B, 1), jnp.int32),           # end_position
        ),
        in_specs=[vmem] * 4,
        out_specs=(vmem,) * 6,
    )(x_t, masks, amap4, wb)

    start_logits, end_logits, type_logits, sp_logits, spos, epos = outs
    # torch returns int64 positions; we return int32 (JAX default integer width).
    return (start_logits, end_logits, type_logits, sp_logits,
            spos.reshape(B), epos.reshape(B))


def reference_forward(x, ctx, qmap, amap, p):
    """Pure-JAX re-implementation of the PyTorch forward (for validation)."""
    start_logits = (x @ p["w_start"].T)[..., 0] + p["b_start"][0, 0] - NEG * (1 - ctx)
    end_logits = (x @ p["w_end"].T)[..., 0] + p["b_end"][0, 0] - NEG * (1 - ctx)
    sp_state = jnp.max(amap[..., None] * x[:, :, None, :], axis=1)       # (B, N, D)
    sp_logits = (sp_state @ p["w_sp"].T)[..., 0] + p["b_sp"][0, 0]        # (B, N)
    type_state = jnp.max(x, axis=1)
    type_logits = type_state @ p["w_type"] + p["b_type"]
    outer = start_logits[:, :, None] + end_logits[:, None, :]
    i = jnp.arange(S)[:, None]
    j = jnp.arange(S)[None, :]
    band = jnp.logical_and(j >= i, (j - i) <= BAND).astype(jnp.float32)
    outer = outer - NEG * (1 - band)[None] - NEG * qmap[:, :, None]
    start_position = jnp.argmax(jnp.max(outer, axis=2), axis=1)
    end_position = jnp.argmax(jnp.max(outer, axis=1), axis=1)
    return (start_logits, end_logits, type_logits, sp_logits,
            start_position, end_position)


if __name__ == "__main__":
    key = jax.random.PRNGKey(0)
    k_x, k_p = jax.random.split(key)

    # Deterministic example inputs.
    context_encoding = jax.random.normal(k_x, (B, S, D), jnp.float32)

    pos = jnp.arange(S)
    context_mask = jnp.broadcast_to((pos < 100).astype(jnp.float32), (B, S))
    query_mapping = jnp.broadcast_to((pos < 10).astype(jnp.float32), (B, S))
    sent_id = jnp.clip((pos - 10) // 12, 0, N_SENT - 1)
    in_ctx = jnp.logical_and(pos >= 10, pos < 100).astype(jnp.float32)
    all_mapping = jnp.broadcast_to(
        jax.nn.one_hot(sent_id, N_SENT, dtype=jnp.float32) * in_ctx[:, None],
        (B, S, N_SENT))

    params = make_params(k_p)

    outs = support_net_forward(context_encoding, context_mask, query_mapping,
                               all_mapping, params)
    outs = jax.block_until_ready(outs)

    # Validate against a pure-JAX reference of the PyTorch semantics.
    refs = reference_forward(context_encoding, context_mask, query_mapping,
                             all_mapping, params)
    names = ["start_logits", "end_logits", "type_logits", "sp_logits"]
    for name, got, want in zip(names, outs[:4], refs[:4]):
        assert got.shape == want.shape, (name, got.shape, want.shape)
        assert jnp.allclose(got, want, rtol=1e-2, atol=1e-2), name
    assert jnp.array_equal(outs[4], refs[4].astype(jnp.int32)), "start_position"
    assert jnp.array_equal(outs[5], refs[5].astype(jnp.int32)), "end_position"

    print("KERNEL_OK")
</pallas_src>

<mosaic_0001>
module attributes {stable_mosaic.version = 11 : i64} {
  func.func @_support_kernel(%arg0: memref<2x32x128xf32, #tpu.memory_space<vmem>>, %arg1: memref<2x2x128xf32, #tpu.memory_space<vmem>>, %arg2: memref<2x8x1x128xf32, #tpu.memory_space<vmem>>, %arg3: memref<40x32xf32, #tpu.memory_space<vmem>>, %arg4: memref<2x128xf32, #tpu.memory_space<vmem>>, %arg5: memref<2x128xf32, #tpu.memory_space<vmem>>, %arg6: memref<2x4xf32, #tpu.memory_space<vmem>>, %arg7: memref<2x8xf32, #tpu.memory_space<vmem>>, %arg8: memref<2x1xi32, #tpu.memory_space<vmem>>, %arg9: memref<2x1xi32, #tpu.memory_space<vmem>>) attributes {dimension_semantics = [], scalar_prefetch = 0 : i64, scratch_operands = 0 : i64, tpu.core_type = #tpu.core_type<tc>} {
    %c0 = arith.constant 0 : index
    %c0_0 = arith.constant 0 : index
    %c0_1 = arith.constant 0 : index
    %0 = vector.load %arg0[%c0, %c0_0, %c0_1] : memref<2x32x128xf32, #tpu.memory_space<vmem>>, vector<2x32x128xf32>
    %c0_2 = arith.constant 0 : index
    %c0_3 = arith.constant 0 : index
    %c0_4 = arith.constant 0 : index
    %1 = vector.load %arg1[%c0_2, %c0_3, %c0_4] : memref<2x2x128xf32, #tpu.memory_space<vmem>>, vector<2x2x128xf32>
    %c0_5 = arith.constant 0 : index
    %c0_6 = arith.constant 0 : index
    %2 = vector.load %arg3[%c0_5, %c0_6] : memref<40x32xf32, #tpu.memory_space<vmem>>, vector<40x32xf32>
    %3 = vector.extract_strided_slice %1 {offsets = [0, 0, 0], sizes = [2, 1, 128], strides = [1, 1, 1]} : vector<2x2x128xf32> to vector<2x1x128xf32>
    %4 = vector.shape_cast %3 : vector<2x1x128xf32> to vector<2x128xf32>
    %5 = vector.extract_strided_slice %1 {offsets = [0, 1, 0], sizes = [2, 1, 128], strides = [1, 1, 1]} : vector<2x2x128xf32> to vector<2x1x128xf32>
    %6 = vector.shape_cast %5 : vector<2x1x128xf32> to vector<2x128xf32>
    %7 = vector.extract_strided_slice %2 {offsets = [0, 0], sizes = [2, 32], strides = [1, 1]} : vector<40x32xf32> to vector<2x32xf32>
    %8 = vector.extract_strided_slice %2 {offsets = [2, 0], sizes = [1, 32], strides = [1, 1]} : vector<40x32xf32> to vector<1x32xf32>
    %9 = vector.extract_strided_slice %2 {offsets = [3, 0], sizes = [1, 32], strides = [1, 1]} : vector<40x32xf32> to vector<1x32xf32>
    %10 = vector.extract_strided_slice %2 {offsets = [8, 0], sizes = [32, 4], strides = [1, 1]} : vector<40x32xf32> to vector<32x4xf32>
    %11 = vector.extract_strided_slice %9 {offsets = [0, 0], sizes = [1, 1], strides = [1, 1]} : vector<1x32xf32> to vector<1x1xf32>
    %12 = vector.extract_strided_slice %9 {offsets = [0, 1], sizes = [1, 1], strides = [1, 1]} : vector<1x32xf32> to vector<1x1xf32>
    %13 = vector.extract_strided_slice %9 {offsets = [0, 2], sizes = [1, 1], strides = [1, 1]} : vector<1x32xf32> to vector<1x1xf32>
    %14 = vector.extract_strided_slice %9 {offsets = [0, 3], sizes = [1, 4], strides = [1, 1]} : vector<1x32xf32> to vector<1x4xf32>
    %15 = vector.shape_cast %7 : vector<2x32xf32> to vector<1x2x32xf32>
    %16 = vector.shape_cast %15 : vector<1x2x32xf32> to vector<1x2x32xf32>
    %17 = vector.broadcast %16 : vector<1x2x32xf32> to vector<2x2x32xf32>
    "tpu.trace_start"() <{level = 10 : i32, message = "bkd,bds->bks"}> : () -> ()
    %cst = arith.constant dense<0.000000e+00> : vector<2x2x128xf32>
    %18 = tpu.matmul %17, %0, %cst {dimension_numbers = #tpu.dot_dimension_numbers<[2], [1], [1], [2], [0, 0, 0, 1, 1, 2], [0], [0]>} : vector<2x2x32xf32>, vector<2x32x128xf32>, vector<2x2x128xf32> -> vector<2x2x128xf32>
    "tpu.trace_stop"() : () -> ()
    %cst_7 = arith.constant 1.000000e+00 : f32
    %19 = vector.broadcast %cst_7 : f32 to vector<2x128xf32>
    %20 = arith.subf %19, %4 : vector<2x128xf32>
    %cst_8 = arith.constant 1.000000e+30 : f32
    %21 = vector.broadcast %cst_8 : f32 to vector<2x128xf32>
    %22 = arith.mulf %21, %20 : vector<2x128xf32>
    %23 = vector.extract_strided_slice %18 {offsets = [0, 0, 0], sizes = [2, 1, 128], strides = [1, 1, 1]} : vector<2x2x128xf32> to vector<2x1x128xf32>
    %24 = vector.shape_cast %23 : vector<2x1x128xf32> to vector<2x128xf32>
    %25 = vector.broadcast %11 : vector<1x1xf32> to vector<2x128xf32>
    %26 = arith.addf %24, %25 : vector<2x128xf32>
    %27 = arith.subf %26, %22 : vector<2x128xf32>
    %28 = vector.extract_strided_slice %18 {offsets = [0, 1, 0], sizes = [2, 1, 128], strides = [1, 1, 1]} : vector<2x2x128xf32> to vector<2x1x128xf32>
    %29 = vector.shape_cast %28 : vector<2x1x128xf32> to vector<2x128xf32>
    %30 = vector.broadcast %12 : vector<1x1xf32> to vector<2x128xf32>
    %31 = arith.addf %29, %30 : vector<2x128xf32>
    %32 = arith.subf %31, %22 : vector<2x128xf32>
    %c0_9 = arith.constant 0 : index
    %c0_10 = arith.constant 0 : index
    %33 = vector.load %arg4[%c0_9, %c0_10] : memref<2x128xf32, #tpu.memory_space<vmem>>, vector<2x128xf32>
    tpu.vector_store %arg4[%c0_9, %c0_10], %27 {strides = array<i32>} : memref<2x128xf32, #tpu.memory_space<vmem>>, vector<2x128xf32>,
    %c0_11 = arith.constant 0 : index
    %c0_12 = arith.constant 0 : index
    %34 = vector.load %arg5[%c0_11, %c0_12] : memref<2x128xf32, #tpu.memory_space<vmem>>, vector<2x128xf32>
    tpu.vector_store %arg5[%c0_11, %c0_12], %32 {strides = array<i32>} : memref<2x128xf32, #tpu.memory_space<vmem>>, vector<2x128xf32>,
    %c0_13 = arith.constant 0 : index
    %c0_14 = arith.constant 0 : index
    %c0_15 = arith.constant 0 : index
    %c0_16 = arith.constant 0 : index
    %35 = vector.load %arg2[%c0_13, %c0_14, %c0_15, %c0_16] : memref<2x8x1x128xf32, #tpu.memory_space<vmem>>, vector<2x8x1x128xf32>
    %36 = vector.shape_cast %0 : vector<2x32x128xf32> to vector<2x1x32x128xf32>
    %37 = vector.broadcast %35 : vector<2x8x1x128xf32> to vector<2x8x32x128xf32>
    %38 = vector.broadcast %36 : vector<2x1x32x128xf32> to vector<2x8x32x128xf32>
    %39 = arith.mulf %37, %38 : vector<2x8x32x128xf32>
    %cst_17 = arith.constant dense<0xFF800000> : vector<2x8x32xf32>
    %40 = vector.multi_reduction <maximumf>, %39, %cst_17 [3] : vector<2x8x32x128xf32> to vector<2x8x32xf32>
    %41 = vector.shape_cast %8 : vector<1x32xf32> to vector<1x1x32xf32>
    %42 = vector.broadcast %41 : vector<1x1x32xf32> to vector<2x8x32xf32>
    %43 = arith.mulf %40, %42 : vector<2x8x32xf32>
    %cst_18 = arith.constant dense<0.000000e+00> : vector<2x8xf32>
    %44 = vector.multi_reduction <add>, %43, %cst_18 [2] : vector<2x8x32xf32> to vector<2x8xf32>
    %45 = vector.broadcast %13 : vector<1x1xf32> to vector<2x8xf32>
    %46 = arith.addf %44, %45 : vector<2x8xf32>
    %c0_19 = arith.constant 0 : index
    %c0_20 = arith.constant 0 : index
    %47 = vector.load %arg7[%c0_19, %c0_20] : memref<2x8xf32, #tpu.memory_space<vmem>>, vector<2x8xf32>
    tpu.vector_store %arg7[%c0_19, %c0_20], %46 {strides = array<i32>} : memref<2x8xf32, #tpu.memory_space<vmem>>, vector<2x8xf32>,
    %cst_21 = arith.constant dense<0xFF800000> : vector<2x32xf32>
    %48 = vector.multi_reduction <maximumf>, %0, %cst_21 [2] : vector<2x32x128xf32> to vector<2x32xf32>
    %cst_22 = arith.constant dense<0.000000e+00> : vector<2x4xf32>
    %49 = tpu.matmul %48, %10, %cst_22 {dimension_numbers = #tpu.dot_dimension_numbers<[1], [0], [0], [1], [0, 0, 1, 1], [], []>} : vector<2x32xf32>, vector<32x4xf32>, vector<2x4xf32> -> vector<2x4xf32>
    %50 = vector.broadcast %14 : vector<1x4xf32> to vector<2x4xf32>
    %51 = arith.addf %49, %50 : vector<2x4xf32>
    %c0_23 = arith.constant 0 : index
    %c0_24 = arith.constant 0 : index
    %52 = vector.load %arg6[%c0_23, %c0_24] : memref<2x4xf32, #tpu.memory_space<vmem>>, vector<2x4xf32>
    tpu.vector_store %arg6[%c0_23, %c0_24], %51 {strides = array<i32>} : memref<2x4xf32, #tpu.memory_space<vmem>>, vector<2x4xf32>,
    %53 = tpu.iota {dimensions = array<i32: 1>} : vector<2x128xi32>
    %c127_i32 = arith.constant 127 : i32
    %54 = tpu.dynamic_rotate %32 by %c127_i32 dim 1 : vector<2x128xf32>, i32 -> vector<2x128xf32>
    %c127_i32_25 = arith.constant 127 : i32
    %55 = vector.broadcast %c127_i32_25 : i32 to vector<2x128xi32>
    %56 = arith.cmpi slt, %53, %55 : vector<2x128xi32>
    %cst_26 = arith.constant -3.000000e+38 : f32
    %57 = vector.broadcast %cst_26 : f32 to vector<2x128xf32>
    %58 = arith.select %56, %54, %57 : vector<2x128xi1>, vector<2x128xf32>
    %59 = arith.maximumf %32, %58 : vector<2x128xf32>
    %c126_i32 = arith.constant 126 : i32
    %60 = tpu.dynamic_rotate %59 by %c126_i32 dim 1 : vector<2x128xf32>, i32 -> vector<2x128xf32>
    %c126_i32_27 = arith.constant 126 : i32
    %61 = vector.broadcast %c126_i32_27 : i32 to vector<2x128xi32>
    %62 = arith.cmpi slt, %53, %61 : vector<2x128xi32>
    %cst_28 = arith.constant -3.000000e+38 : f32
    %63 = vector.broadcast %cst_28 : f32 to vector<2x128xf32>
    %64 = arith.select %62, %60, %63 : vector<2x128xi1>, vector<2x128xf32>
    %65 = arith.maximumf %59, %64 : vector<2x128xf32>
    %c124_i32 = arith.constant 124 : i32
    %66 = tpu.dynamic_rotate %65 by %c124_i32 dim 1 : vector<2x128xf32>, i32 -> vector<2x128xf32>
    %c124_i32_29 = arith.constant 124 : i32
    %67 = vector.broadcast %c124_i32_29 : i32 to vector<2x128xi32>
    %68 = arith.cmpi slt, %53, %67 : vector<2x128xi32>
    %cst_30 = arith.constant -3.000000e+38 : f32
    %69 = vector.broadcast %cst_30 : f32 to vector<2x128xf32>
    %70 = arith.select %68, %66, %69 : vector<2x128xi1>, vector<2x128xf32>
    %71 = arith.maximumf %65, %70 : vector<2x128xf32>
    %c120_i32 = arith.constant 120 : i32
    %72 = tpu.dynamic_rotate %71 by %c120_i32 dim 1 : vector<2x128xf32>, i32 -> vector<2x128xf32>
    %c120_i32_31 = arith.constant 120 : i32
    %73 = vector.broadcast %c120_i32_31 : i32 to vector<2x128xi32>
    %74 = arith.cmpi slt, %53, %73 : vector<2x128xi32>
    %cst_32 = arith.constant -3.000000e+38 : f32
    %75 = vector.broadcast %cst_32 : f32 to vector<2x128xf32>
    %76 = arith.select %74, %72, %75 : vector<2x128xi1>, vector<2x128xf32>
    %77 = arith.maximumf %71, %76 : vector<2x128xf32>
    %78 = arith.addf %27, %77 : vector<2x128xf32>
    %cst_33 = arith.constant 1.000000e+30 : f32
    %79 = vector.broadcast %cst_33 : f32 to vector<2x128xf32>
    %80 = arith.mulf %79, %6 : vector<2x128xf32>
    %81 = arith.subf %78, %80 : vector<2x128xf32>
    %cst_34 = arith.constant 1.000000e+30 : f32
    %82 = vector.broadcast %cst_34 : f32 to vector<2x128xf32>
    %83 = arith.mulf %82, %6 : vector<2x128xf32>
    %84 = arith.subf %27, %83 : vector<2x128xf32>
    %c1_i32 = arith.constant 1 : i32
    %85 = tpu.dynamic_rotate %84 by %c1_i32 dim 1 : vector<2x128xf32>, i32 -> vector<2x128xf32>
    %c1_i32_35 = arith.constant 1 : i32
    %86 = vector.broadcast %c1_i32_35 : i32 to vector<2x128xi32>
    %87 = arith.cmpi sge, %53, %86 : vector<2x128xi32>
    %cst_36 = arith.constant -3.000000e+38 : f32
    %88 = vector.broadcast %cst_36 : f32 to vector<2x128xf32>
    %89 = arith.select %87, %85, %88 : vector<2x128xi1>, vector<2x128xf32>
    %90 = arith.maximumf %84, %89 : vector<2x128xf32>
    %c2_i32 = arith.constant 2 : i32
    %91 = tpu.dynamic_rotate %90 by %c2_i32 dim 1 : vector<2x128xf32>, i32 -> vector<2x128xf32>
    %c2_i32_37 = arith.constant 2 : i32
    %92 = vector.broadcast %c2_i32_37 : i32 to vector<2x128xi32>
    %93 = arith.cmpi sge, %53, %92 : vector<2x128xi32>
    %cst_38 = arith.constant -3.000000e+38 : f32
    %94 = vector.broadcast %cst_38 : f32 to vector<2x128xf32>
    %95 = arith.select %93, %91, %94 : vector<2x128xi1>, vector<2x128xf32>
    %96 = arith.maximumf %90, %95 : vector<2x128xf32>
    %c4_i32 = arith.constant 4 : i32
    %97 = tpu.dynamic_rotate %96 by %c4_i32 dim 1 : vector<2x128xf32>, i32 -> vector<2x128xf32>
    %c4_i32_39 = arith.constant 4 : i32
    %98 = vector.broadcast %c4_i32_39 : i32 to vector<2x128xi32>
    %99 = arith.cmpi sge, %53, %98 : vector<2x128xi32>
    %cst_40 = arith.constant -3.000000e+38 : f32
    %100 = vector.broadcast %cst_40 : f32 to vector<2x128xf32>
    %101 = arith.select %99, %97, %100 : vector<2x128xi1>, vector<2x128xf32>
    %102 = arith.maximumf %96, %101 : vector<2x128xf32>
    %c8_i32 = arith.constant 8 : i32
    %103 = tpu.dynamic_rotate %102 by %c8_i32 dim 1 : vector<2x128xf32>, i32 -> vector<2x128xf32>
    %c8_i32_41 = arith.constant 8 : i32
    %104 = vector.broadcast %c8_i32_41 : i32 to vector<2x128xi32>
    %105 = arith.cmpi sge, %53, %104 : vector<2x128xi32>
    %cst_42 = arith.constant -3.000000e+38 : f32
    %106 = vector.broadcast %cst_42 : f32 to vector<2x128xf32>
    %107 = arith.select %105, %103, %106 : vector<2x128xi1>, vector<2x128xf32>
    %108 = arith.maximumf %102, %107 : vector<2x128xf32>
    %109 = arith.addf %32, %108 : vector<2x128xf32>
    %cst_43 = arith.constant dense<0xFF800000> : vector<2xf32>
    %110 = vector.multi_reduction <maximumf>, %81, %cst_43 [1] : vector<2x128xf32> to vector<2xf32>
    %111 = vector.shape_cast %110 : vector<2xf32> to vector<2x1xf32>
    %112 = vector.broadcast %111 : vector<2x1xf32> to vector<2x128xf32>
    %113 = arith.cmpf oeq, %81, %112 : vector<2x128xf32>
    %c128_i32 = arith.constant 128 : i32
    %114 = vector.broadcast %c128_i32 : i32 to vector<2x128xi32>
    %115 = arith.select %113, %53, %114 : vector<2x128xi1>, vector<2x128xi32>
    %cst_44 = arith.constant dense<2147483647> : vector<2xi32>
    %116 = vector.multi_reduction <minsi>, %115, %cst_44 [1] : vector<2x128xi32> to vector<2xi32>
    %117 = vector.shape_cast %116 : vector<2xi32> to vector<2x1xi32>
    %c0_45 = arith.constant 0 : index
    %c0_46 = arith.constant 0 : index
    %118 = vector.load %arg8[%c0_45, %c0_46] : memref<2x1xi32, #tpu.memory_space<vmem>>, vector<2x1xi32>
    tpu.vector_store %arg8[%c0_45, %c0_46], %117 {strides = array<i32>} : memref<2x1xi32, #tpu.memory_space<vmem>>, vector<2x1xi32>,
    %cst_47 = arith.constant dense<0xFF800000> : vector<2xf32>
    %119 = vector.multi_reduction <maximumf>, %109, %cst_47 [1] : vector<2x128xf32> to vector<2xf32>
    %120 = vector.shape_cast %119 : vector<2xf32> to vector<2x1xf32>
    %121 = vector.broadcast %120 : vector<2x1xf32> to vector<2x128xf32>
    %122 = arith.cmpf oeq, %109, %121 : vector<2x128xf32>
    %c128_i32_48 = arith.constant 128 : i32
    %123 = vector.broadcast %c128_i32_48 : i32 to vector<2x128xi32>
    %124 = arith.select %122, %53, %123 : vector<2x128xi1>, vector<2x128xi32>
    %cst_49 = arith.constant dense<2147483647> : vector<2xi32>
    %125 = vector.multi_reduction <minsi>, %124, %cst_49 [1] : vector<2x128xi32> to vector<2xi32>
    %126 = vector.shape_cast %125 : vector<2xi32> to vector<2x1xi32>
    %c0_50 = arith.constant 0 : index
    %c0_51 = arith.constant 0 : index
    %127 = vector.load %arg9[%c0_50, %c0_51] : memref<2x1xi32, #tpu.memory_space<vmem>>, vector<2x1xi32>
    tpu.vector_store %arg9[%c0_50, %c0_51], %126 {strides = array<i32>} : memref<2x1xi32, #tpu.memory_space<vmem>>, vector<2x1xi32>,
    return
  }
}

</mosaic_0001>

<bundles_post_ra>
// kernel: support_net_forward.1
= control target key start
LH: loop header
LB: loop body
LE: loop exit
PB: predicated region body
PF: predicated region fallthrough
CT: control target
= control target key end

     0   :  { %15 = vsyncpa [#allocation3], 0  ;;  %s2841_s0 = inlined_call_operand.vmem [shape: f32[2,32,128], index: 0, kind: input, shape index: {}]   ;;  %s2842_s1 = inlined_call_operand.vmem [shape: f32[2,2,128], index: 1, kind: input, shape index: {}]   ;;  %s2843_s2 = inlined_call_operand.vmem [shape: f32[2,8,1,128], index: 2, kind: input, shape index: {}]   ;;  %s2844_s3 = inlined_call_operand.vmem [shape: f32[40,32], index: 3, kind: input, shape index: {}]   ;;  %s2845_s4 = inlined_call_operand.hbm [shape: f32[2,128], index: 4, kind: output, shape index: {0}]   ;;  %s2846_s5 = inlined_call_operand.hbm [shape: f32[2,128], index: 5, kind: output, shape index: {1}]   ;;  %s2847_s6 = inlined_call_operand.hbm [shape: f32[2,4], index: 6, kind: output, shape index: {2}]   ;;  %s2848_s7 = inlined_call_operand.hbm [shape: f32[2,8], index: 7, kind: output, shape index: {3}]   ;;  %s2849_s8 = inlined_call_operand.vmem [shape: s32[2,1], index: 8, kind: output, shape index: {4}]   ;;  %s2850_s9 = inlined_call_operand.vmem [shape: s32[2,1], index: 9, kind: output, shape index: {5}]  }
   0x1   :  { %16 = vsyncpa [#allocation5], 0  ;;  %v1935_v0 = vld [vmem:[%s2841_s0] sm:$0xff]  ;;  %v1940_v1 = vld [vmem:[%s2841_s0 + $0x8] sm:$0xff]  ;;  %v2853_v3 = vmov 0.0|0.0   ;;  %vm1866_vm0 = vmmov 0  }
   0x2   :  { %v1945_v2 = vld [vmem:[%s2841_s0 + $0x20] sm:$0xff]  ;;  %1727 = vmatprep.subr.bf16.mxu0 %v2853_v3  ;;  %1733 = vmatprep.subr.bf16.mxu1 %v2853_v3  ;;  %v1728_v4 = vpack.c.bf16 %v1940_v1, %v1935_v0  ;;  %v1954_v5 = vld [vmem:[%s2841_s0 + $0x28] sm:$0xff]  ;;  %v1959_v6 = vld [vmem:[%s2841_s0 + $0x10] sm:$0xff]  ;;  %v1867_v11 = vmov 0.0   ;;  %s1868_s28 = smov 127   ;;  %vm41_vm1 = vcmask 261120  }
   0x3   :  { %v1964_v7 = vld [vmem:[%s2841_s0 + $0x18] sm:$0xff]  ;;  %v1734_v8 = vpack.c.bf16 %v1954_v5, %v1945_v2  ;;  %v1971_v9 = vld [vmem:[%s2841_s0 + $0x30] sm:$0xff]  ;;  %1702 = vmatprep.mubr.msk.f32.mxu0 %vm1866_vm0, %v1867_v11  ;;  %1713 = vmatprep.mubr.msk.f32.mxu1 %vm1866_vm0, %v1867_v11  ;;  %v1983_v12 = vld [vmem:[%s2844_s3] sm:$0xff] }
   0x4   :  { %v1976_v10 = vld [vmem:[%s2841_s0 + $0x38] sm:$0xff]  ;;  %1729 = vmatpush3.bf16.msra.mxu0 %v1728_v4  ;;  %v1731_v13 = vpack.c.bf16 %v1964_v7, %v1959_v6  ;;  %v1988_v14 = vrot.slane %v1983_v12, 3  ;;  %v1662_v15 = vld [vmem:[%s2843_s2] ss:$0 sm:$0xff] }
   0x5   :  { %1735 = vmatpush3.bf16.msra.mxu1 %v1734_v8  ;;  %1730 = vmatprep.subr.bf16.mxu0 %v2853_v3  ;;  %v1737_v16 = vpack.c.bf16 %v1976_v10, %v1971_v9  ;;  %v339_v17 = vmul.f32 %v1662_v15, %v1940_v1  ;;  %v340_v18 = vmul.f32 %v1662_v15, %v1959_v6 }
   0x6   :  { %2862 = vst [vmem:[#allocation12_spill] sm:$0xff] %v1988_v14  ;;  %1736 = vmatprep.subr.bf16.mxu1 %v2853_v3  ;;  %197 = vrot.lane.b32.xlu0 %v1988_v14, %s1868_s28  ;;  %1745 = vpush %v1988_v14 }
   0x7   :  { %404 = vmax.xlane.f32.xlu1 %v339_v17 }
   0x8   :  { %1732 = vmatpush3.bf16.msra.mxu0 %v1731_v13 }
   0x9   :  { %1738 = vmatpush3.bf16.msra.mxu1 %v1737_v16 }
   0xa   :  { %17 = vsyncpa [#allocation8], 0  ;;  %1739 = vmatprep.subr.bf16.mxu0 %v2853_v3  ;;  %v341_v19 = vmul.f32 %v1662_v15, %v1964_v7  ;;  %v1663_v20 = vld [vmem:[%s2843_s2 + $0x1] ss:$0 sm:$0xff]  ;;  %v2017_v23 = vld [vmem:[%s2843_s2 + $0x4] ss:$0 sm:$0xff]  ;;  %v338_v28 = vmul.f32 %v1662_v15, %v1935_v0 }
   0xb   :  { %1703 = vmatmul.mubr.msk.f32.vlgmr.msra.gmra.mrb[0].mxu0 %vm41_vm1, %v1983_v12  ;;  %406 = vmax.xlane.f32.xlu1 %v340_v18  ;;  %v342_v21 = vmul.f32 %v1663_v20, %v1935_v0  ;;  %v344_v22 = vmul.f32 %v1663_v20, %v1959_v6  ;;  %v354_v24 = vmul.f32 %v2017_v23, %v1935_v0  ;;  %v2026_v26 = vld [vmem:[%s2843_s2 + $0x5] ss:$0 sm:$0xff]  ;;  %v2036_v30 = vld [vmem:[%s2843_s2 + $0x6] ss:$0 sm:$0xff]  ;;  %v1664_v34 = vld [vmem:[%s2843_s2 + $0x2] ss:$0 sm:$0xff] }
   0xc   :  { %1714 = vmatmul.mubr.msk.f32.vlgmr.msra.gmra.mrb[0].mxu1 %vm41_vm1, %v1983_v12  ;;  %1724 = vmatprep.mubr.msk.f32.mxu0 %vm1866_vm0, %v1867_v11  ;;  %v356_v25 = vmul.f32 %v2017_v23, %v1959_v6  ;;  %v358_v27 = vmul.f32 %v2026_v26, %v1935_v0  ;;  %v360_v29 = vmul.f32 %v2026_v26, %v1959_v6  ;;  %v2050_v36 = vld [vmem:[%s2843_s2 + $0x7] ss:$0 sm:$0xff]  ;;  %v2061_v41 = vld [vmem:[%s2843_s2 + $0x8] ss:$0 sm:$0xff]  ;;  %v1665_v45 = vld [vmem:[%s2843_s2 + $0x3] ss:$0 sm:$0xff] }
   0xd   :  { %v343_v31 = vmul.f32 %v1663_v20, %v1940_v1  ;;  %v362_v32 = vmul.f32 %v2036_v30, %v1935_v0  ;;  %v345_v33 = vmul.f32 %v1663_v20, %v1964_v7  ;;  %v363_v35 = vmul.f32 %v2036_v30, %v1940_v1  ;;  %v2075_v47 = vld [vmem:[%s2843_s2 + $0x9] ss:$0 sm:$0xff]  ;;  %v2086_v52 = vld [vmem:[%s2843_s2 + $0xa] ss:$0 sm:$0xff]  ;;  %v1673_v57 = vld [vmem:[%s2843_s2 + $0xb] ss:$0 sm:$0xff] }
   0xe   :  { %v346_v37 = vmul.f32 %v1664_v34, %v1935_v0  ;;  %v366_v38 = vmul.f32 %v2050_v36, %v1935_v0  ;;  %v347_v39 = vmul.f32 %v1664_v34, %v1940_v1  ;;  %v368_v40 = vmul.f32 %v2050_v36, %v1959_v6  ;;  %v1674_v60 = vld [vmem:[%s2843_s2 + $0xc] ss:$0 sm:$0xff]  ;;  %v1675_v63 = vld [vmem:[%s2843_s2 + $0xd] ss:$0 sm:$0xff]  ;;  %v1676_v16 = vld [vmem:[%s2843_s2 + $0xe] ss:$0 sm:$0xff] }
   0xf   :  { %408 = vmax.xlane.f32.xlu1 %v341_v19  ;;  %v348_v42 = vmul.f32 %v1664_v34, %v1959_v6  ;;  %v370_v43 = vmul.f32 %v2061_v41, %v1945_v2  ;;  %v349_v44 = vmul.f32 %v1664_v34, %v1964_v7  ;;  %v372_v46 = vmul.f32 %v2061_v41, %v1971_v9  ;;  %s1871_s22 = smov 2   ;;  %s1873_s0 = smov 124  }
  0x10   :  { %v350_v48 = vmul.f32 %v1665_v45, %v1935_v0  ;;  %v374_v49 = vmul.f32 %v2075_v47, %v1945_v2  ;;  %v351_v50 = vmul.f32 %v1665_v45, %v1940_v1  ;;  %v376_v51 = vmul.f32 %v2075_v47, %v1971_v9  ;;  %s1874_s11 = smov 4   ;;  %s1875_s12 = smov 120  }
  0x11   :  { %v352_v53 = vmul.f32 %v1665_v45, %v1959_v6  ;;  %v378_v54 = vmul.f32 %v2086_v52, %v1945_v2  ;;  %v353_v55 = vmul.f32 %v1665_v45, %v1964_v7  ;;  %v380_v56 = vmul.f32 %v2086_v52, %v1971_v9  ;;  %s1876_s13 = smov 8   ;;  %s1877_s16 = smov 125  }
  0x12   :  { %v382_v58 = vmul.f32 %v1673_v57, %v1945_v2  ;;  %v384_v59 = vmul.f32 %v1673_v57, %v1971_v9  ;;  %v386_v61 = vmul.f32 %v1674_v60, %v1945_v2  ;;  %v388_v62 = vmul.f32 %v1674_v60, %v1971_v9  ;;  %s1879_s18 = smov [#allocation2]  }
  0x13   :  { %410 = vmax.xlane.f32.xlu1 %v342_v21  ;;  %v355_v4 = vmul.f32 %v2017_v23, %v1940_v1  ;;  %v390_v8 = vmul.f32 %v1675_v63, %v1945_v2  ;;  %v357_v11 = vmul.f32 %v2017_v23, %v1964_v7  ;;  %v392_v13 = vmul.f32 %v1675_v63, %v1971_v9  ;;  %v1677_v21 = vld [vmem:[%s2843_s2 + $0xf] ss:$0 sm:$0xff]  ;;  %s1878_s2 = smov [#allocation4]   ;;  %s1603_s19 = sshll.u32 %s1879_s18, 4  ;;  %s1604_s19 = int_to_ptr.vmem [resolvable:$true] %s1603_s19 }
  0x14   :  { %v359_v15 = vmul.f32 %v2026_v26, %v1940_v1  ;;  %v394_v17 = vmul.f32 %v1676_v16, %v1945_v2  ;;  %v361_v18 = vmul.f32 %v2026_v26, %v1964_v7  ;;  %v396_v19 = vmul.f32 %v1676_v16, %v1971_v9  ;;  %s1613_s17 = sshll.u32 %s1878_s2, 4  ;;  %s1614_s17 = int_to_ptr.vmem [resolvable:$true] %s1613_s17 }
  0x15   :  { %v364_v20 = vmul.f32 %v2036_v30, %v1959_v6  ;;  %v365_v23 = vmul.f32 %v2036_v30, %v1964_v7  ;;  %v369_v26 = vmul.f32 %v2050_v36, %v1964_v7  ;;  %v375_v30 = vmul.f32 %v2075_v47, %v1954_v5  ;;  %p1776_p1 = scmp.lt.s32.totalorder %s1614_s17, %s1614_s17 }
  0x16   :  { %v383_v34 = vmul.f32 %v1673_v57, %v1954_v5  ;;  %vm215_vm2 = vcmask 1041409   ;;  %vm222_vm3 = vcmask 1042434   ;;  %vm892_vm7 = vcmask 195712  }
  0x17   :  { %414 = vmax.xlane.f32.xlu1 %v344_v22  ;;  %v398_v22 = vmul.f32 %v1677_v21, %v1945_v2  ;;  %vm885_vm8 = vcmask 130112   ;;  %vm899_vm9 = vcmask 261312   ;;  %vm1530_vm14 = vcmask 1041408  }
  0x18   :  { %vm1188_vm15 = vcmask 1043459  }
  0x1b   :  { %434 = vmax.xlane.f32.xlu1 %v354_v24  ;;  %v400_v24 = vmul.f32 %v1677_v21, %v1971_v9 }
  0x1f   :  { %438 = vmax.xlane.f32.xlu1 %v356_v25  ;;  %v367_v25 = vmul.f32 %v2050_v36, %v1940_v1  ;;  %v387_v36 = vmul.f32 %v1674_v60, %v1954_v5 }
  0x23   :  { %442 = vmax.xlane.f32.xlu1 %v358_v27 }
  0x25   :  { %402 = vmax.xlane.f32.xlu0 %v338_v28  ;;  %v371_v28 = vmul.f32 %v2061_v41, %v1954_v5 }
  0x27   :  { %446 = vmax.xlane.f32.xlu1 %v360_v29  ;;  %v373_v29 = vmul.f32 %v2061_v41, %v1976_v10  ;;  %v395_v41 = vmul.f32 %v1676_v16, %v1954_v5 }
  0x29   :  { %412 = vmax.xlane.f32.xlu0 %v343_v31  ;;  %v377_v31 = vmul.f32 %v2075_v47, %v1976_v10 }
  0x2b   :  { %450 = vmax.xlane.f32.xlu1 %v362_v32  ;;  %v379_v32 = vmul.f32 %v2086_v52, %v1954_v5 }
  0x2d   :  { %416 = vmax.xlane.f32.xlu0 %v345_v33  ;;  %v381_v33 = vmul.f32 %v2086_v52, %v1976_v10  ;;  %v35_v52 = vld [vmem:[%s2842_s1 + $0x2] sm:$0x3] }
  0x2f   :  { %452 = vmax.xlane.f32.xlu1 %v363_v35  ;;  %v385_v35 = vmul.f32 %v1673_v57, %v1976_v10 }
  0x31   :  { %418 = vmax.xlane.f32.xlu0 %v346_v37  ;;  %v389_v37 = vmul.f32 %v1674_v60, %v1976_v10 }
  0x33   :  { %458 = vmax.xlane.f32.xlu1 %v366_v38  ;;  %v391_v38 = vmul.f32 %v1675_v63, %v1954_v5 }
  0x35   :  { %420 = vmax.xlane.f32.xlu0 %v347_v39  ;;  %v393_v39 = vmul.f32 %v1675_v63, %v1976_v10 }
  0x37   :  { %462 = vmax.xlane.f32.xlu1 %v368_v40  ;;  %s1746_s20 = spop %1745 }
  0x38   :  { %v191_v57 = vstv %s1746_s20  ;;  %s1771_s20 = scalar_lea.vmem %s1614_s17, 32 }
  0x39   :  { %422 = vmax.xlane.f32.xlu0 %v348_v42  ;;  %v397_v42 = vmul.f32 %v1676_v16, %v1976_v10  ;;  %p1772_p0 = scmp.ne.s32.totalorder %s1614_s17, %s1771_s20  ;;  %p1777_p2 = scmp.lt.s32.totalorder %s1771_s20, %s1771_s20 }
  0x3b   :  { %466 = vmax.xlane.f32.xlu1 %v370_v43  ;;  %p1778_p3 = por %p1777_p2, %p1776_p1 }
  0x3d   :  { %424 = vmax.xlane.f32.xlu0 %v349_v44  ;;  %v399_v44 = vmul.f32 %v1677_v21, %v1954_v5  ;;  %p1779_p4 = pnand %p1778_p3, %p1772_p0 }
  0x3f   :  { %470 = vmax.xlane.f32.xlu1 %v372_v46  ;;  %v401_v46 = vmul.f32 %v1677_v21, %v1976_v10 }
  0x41   :  { %426 = vmax.xlane.f32.xlu0 %v350_v48 }
  0x43   :  { %474 = vmax.xlane.f32.xlu1 %v374_v49 }
  0x45   :  { %428 = vmax.xlane.f32.xlu0 %v351_v50 }
  0x47   :  { %478 = vmax.xlane.f32.xlu1 %v376_v51  ;;  %v34_v51 = vld [vmem:[%s2842_s1] sm:$0x3]  ;;  %s1869_s1 = smov 1  }
  0x49   :  { %430 = vmax.xlane.f32.xlu0 %v352_v53 }
  0x4b   :  { %482 = vmax.xlane.f32.xlu1 %v378_v54  ;;  %v185_v54 = vsub.f32 1.0, %v34_v51 }
  0x4d   :  { %432 = vmax.xlane.f32.xlu0 %v353_v55  ;;  %v187_v55 = vmul.f32 1e+30, %v185_v54 }
  0x4f   :  { %486 = vmax.xlane.f32.xlu1 %v380_v56  ;;  %v206_v60 = vrot.slane %v187_v55, 7 }
  0x51   :  { %436 = vmax.xlane.f32.xlu0 %v355_v4 }
  0x53   :  { %490 = vmax.xlane.f32.xlu1 %v382_v58 }
  0x55   :  { %440 = vmax.xlane.f32.xlu0 %v357_v11  ;;  %v2185_v11 = vmul.f32 1e+30, %v34_v51 }
  0x57   :  { %494 = vmax.xlane.f32.xlu1 %v384_v59  ;;  %v2183_v59 = vmul.f32 1e+30, %v35_v52  ;;  %2866 = vst [vmem:[#allocation16_spill] sm:$0xff] %v2185_v11 }
  0x59   :  { %444 = vmax.xlane.f32.xlu0 %v359_v15  ;;  %2865 = vst [vmem:[#allocation15_spill] sm:$0xff] %v2183_v59 }
  0x5b   :  { %498 = vmax.xlane.f32.xlu1 %v386_v61 }
  0x5d   :  { %448 = vmax.xlane.f32.xlu0 %v361_v18 }
  0x5f   :  { %502 = vmax.xlane.f32.xlu1 %v388_v62 }
  0x61   :  { %454 = vmax.xlane.f32.xlu0 %v364_v20 }
  0x63   :  { %506 = vmax.xlane.f32.xlu1 %v390_v8 }
  0x65   :  { %456 = vmax.xlane.f32.xlu0 %v365_v23 }
  0x67   :  { %510 = vmax.xlane.f32.xlu1 %v392_v13 }
  0x69   :  { %460 = vmax.xlane.f32.xlu0 %v367_v25  ;;  %v2851_v25 = vrot.slane %v2185_v11, 1 }
  0x6b   :  { %514 = vmax.xlane.f32.xlu1 %v394_v17  ;;  %v2852_v17 = vrot.slane %v2183_v59, 1 }
  0x6d   :  { %464 = vmax.xlane.f32.xlu0 %v369_v26 }
  0x6f   :  { %518 = vmax.xlane.f32.xlu1 %v396_v19 }
  0x71   :  { %468 = vmax.xlane.f32.xlu0 %v371_v28 }
  0x73   :  { %522 = vmax.xlane.f32.xlu1 %v398_v22 }
  0x75   :  { %472 = vmax.xlane.f32.xlu0 %v373_v29 }
  0x77   :  { %526 = vmax.xlane.f32.xlu1 %v400_v24 }
  0x78   :  { %v198_v27 = vpop.permute.xlu0 %197 }
  0x79   :  { %1747 = vpush %v198_v27  ;;  %476 = vmax.xlane.f32.xlu0 %v375_v30 }
  0x7d   :  { %480 = vmax.xlane.f32.xlu0 %v377_v31 }
  0x81   :  { %484 = vmax.xlane.f32.xlu0 %v379_v32 }
  0x85   :  { %488 = vmax.xlane.f32.xlu0 %v381_v33 }
  0x89   :  { %492 = vmax.xlane.f32.xlu0 %v383_v34 }
  0x8d   :  { %496 = vmax.xlane.f32.xlu0 %v385_v35 }
  0x91   :  { %500 = vmax.xlane.f32.xlu0 %v387_v36 }
  0x94   :  { %v2153_v40 = vpop.xlane.xlu1 %404 }
  0x95   :  { %504 = vmax.xlane.f32.xlu0 %v389_v37 }
  0x98   :  { %v2157_v43 = vpop.xlane.xlu1 %406 }
  0x99   :  { %508 = vmax.xlane.f32.xlu0 %v391_v38 }
  0x9c   :  { %v2160_v45 = vpop.xlane.xlu1 %408 }
  0x9d   :  { %512 = vmax.xlane.f32.xlu0 %v393_v39 }
  0xa0   :  { %v2163_v47 = vpop.xlane.xlu1 %410 }
  0xa1   :  { %516 = vmax.xlane.f32.xlu0 %v395_v41 }
  0xa4   :  { %v2166_v48 = vpop.xlane.xlu1 %414 }
  0xa5   :  { %520 = vmax.xlane.f32.xlu0 %v397_v42 }
  0xa8   :  { %v2169_v49 = vpop.xlane.xlu1 %434 }
  0xa9   :  { %524 = vmax.xlane.f32.xlu0 %v399_v44 }
  0xaa   :  { %s1748_s21 = spop %1747 }
  0xab   :  { %v200_v58 = vstv %s1748_s21 }
  0xac   :  { %v2171_v50 = vpop.xlane.xlu1 %438 }
  0xad   :  { %528 = vmax.xlane.f32.xlu0 %v401_v46  ;;  %2863 = vst [vmem:[#allocation13_spill] sm:$0xff] %v2171_v50 }
  0xb0   :  { %v2179_v53 = vpop.xlane.xlu1 %442 }
  0xb1   :  { %1236 = vmax.xlane.f32.xlu0 %v1940_v1  ;;  %v186_v1 = vsub.f32 1.0, %v35_v52 }
  0xb2   :  { %v2225_v38 = vpop.xlane.xlu0 %402 }
  0xb4   :  { %v2181_v56 = vpop.xlane.xlu1 %446 }
  0xb5   :  { %1244 = vmax.xlane.f32.xlu0 %v1954_v5  ;;  %v188_v5 = vmul.f32 1e+30, %v186_v1  ;;  %2864 = vst [vmem:[#allocation14_spill] sm:$0xff] %v2181_v56 }
  0xb6   :  { %v2229_v41 = vpop.xlane.xlu0 %412 }
  0xb7   :  { %v207_v61 = vrot.slane %v188_v5, 7 }
  0xb8   :  { %v2188_v19 = vpop.xlane.xlu1 %450 }
  0xb9   :  { %2867 = vst [vmem:[#allocation17_spill] sm:$0xff] %v2188_v19 }
  0xba   :  { %v2233_v44 = vpop.xlane.xlu0 %416 }
  0xbc   :  { %v2211_v31 = vpop.xlane.xlu1 %452 }
  0xbd   :  { %2872 = vst [vmem:[#allocation22_spill] sm:$0xff] %v2211_v31 }
  0xbe   :  { %v2237_v51 = vpop.xlane.xlu0 %418 }
  0xc0   :  { %v2221_v36 = vpop.xlane.xlu1 %458 }
  0xc1   :  { %2873 = vst [vmem:[#allocation23_spill] sm:$0xff] %v2221_v36 }
  0xc2   :  { %v2241_v54 = vpop.xlane.xlu0 %420 }
  0xc4   :  { %v2223_v37 = vpop.xlane.xlu1 %462 }
  0xc5   :  { %2874 = vst [vmem:[#allocation24_spill] sm:$0xff] %v2223_v37 }
  0xc8   :  { %v2227_v39 = vpop.xlane.xlu1 %466 }
  0xcc   :  { %v2231_v42 = vpop.xlane.xlu1 %470 }
  0xd0   :  { %v2235_v46 = vpop.xlane.xlu1 %474 }
  0xd4   :  { %v2239_v52 = vpop.xlane.xlu1 %478 }
  0xd8   :  { %v2244_v1 = vpop.xlane.xlu1 %482 }
  0xde   :  { %v111_v62 = vpop.f32.mrb[0].mxu0 }
  0xdf   :  { %v181_v63 = vpop.f32.mrb[0].mxu1  ;;  %v193_v4 = vadd.f32 %v191_v57, %v111_v62  ;;  %v202_v8 = vadd.f32 %v200_v58, %v111_v62  ;;  %v1704_v13 = vpop.f32.mrb[1].mxu0 }
  0xe0   :  { %v194_v15 = vadd.f32 %v191_v57, %v181_v63  ;;  %v203_v16 = vadd.f32 %v200_v58, %v181_v63  ;;  %v1715_v18 = vpop.f32.mrb[1].mxu1 }
  0xe1   :  { %v2190_v20 = vsub.f32 %v202_v8, %v206_v60  ;;  %v2196_v23 = vsub.f32 %v193_v4, %v187_v55  ;;  %v2247_v55 = vpop.xlane.xlu0 %422 }
  0xe2   :  { %v2192_v21 = vsub.f32 %v194_v15, %v188_v5  ;;  %v2194_v22 = vsub.f32 %v203_v16, %v207_v61  ;;  %v2249_v5 = vpop.xlane.xlu1 %486 }
  0xe3   :  { %2868 = vst [vmem:[#allocation18_spill] sm:$0xff] %v2190_v20  ;;  %2871 = vst [vmem:[#allocation21_spill] sm:$0xff] %v2196_v23  ;;  %v1379_v24 = vrot.slane %v2190_v20, 1  ;;  %v1455_v34 = vsub.f32 %v2196_v23, %v2851_v25 }
  0xe4   :  { %2869 = vst [vmem:[#allocation19_spill] sm:$0xff] %v2192_v21  ;;  %2870 = vst [vmem:[#allocation20_spill] sm:$0xff] %v2194_v22  ;;  %v2203_v26 = vsub.f32 %v2192_v21, %v2852_v17  ;;  %v221_v27 = vrot.slane %v2194_v22, 7  ;;  %v214_v28 = vrot.slane %v2192_v21, 7 }
  0xe5   :  { %v1380_v29 = vsel %vm215_vm2, %v2194_v22, %v1379_v24  ;;  %v2251_v57 = vpop.xlane.xlu0 %424 }
  0xe6   :  { %1382 = vrot.lane.b32.xlu1 %v1380_v29, %s1868_s28  ;;  %v1459_v30 = vrot.slane %v2203_v26, 7  ;;  %v223_v32 = vsel %vm222_vm3, %v221_v27, %v2190_v20  ;;  %v216_v33 = vsel %vm215_vm2, %v214_v28, %v2196_v23  ;;  %v2253_v58 = vpop.xlane.xlu1 %490  ;;  %s1870_s28 = smov 126  }
  0xe7   :  { %225 = vst [vmem:[#allocation4 - $0x1] sm:$0x6] %v223_v32  ;;  %218 = vst [vmem:[#allocation2] sm:$0x3] %v216_v33 }
  0xe8   :  { %v1460_v35 = vsel %vm215_vm2, %v1459_v30, %v1455_v34  ;;  %v530_v30 = vlaneseq }
  0xe9   :  { %v2255_v60 = vpop.xlane.xlu0 %426 }
  0xea   :  { %1462 = vrot.lane.b32.xlu1 %v1460_v35, %s1869_s1  ;;  %v2257_v61 = vpop.xlane.xlu1 %494  ;;  %v2291_v35 = vand.u32 127, %v530_v30 }
  0xec   :  { %vm1384_vm4 = vcmp.lt.s32.totalorder %v2291_v35, 127  ;;  %vm1464_vm5 = vcmp.ge.s32.totalorder %v2291_v35, 1  ;;  %vm1399_vm6 = vcmp.lt.s32.totalorder %v2291_v35, 126  ;;  %vm1479_vm10 = vcmp.ge.s32.totalorder %v2291_v35, 2 }
  0xed   :  { %v2259_v62 = vpop.xlane.xlu0 %428  ;;  %vm1414_vm11 = vcmp.lt.s32.totalorder %v2291_v35, 124  ;;  %vm1494_vm12 = vcmp.ge.s32.totalorder %v2291_v35, 4  ;;  %vm1429_vm13 = vcmp.lt.s32.totalorder %v2291_v35, 120  ;;  %vm1509_vm0 = vcmp.ge.s32.totalorder %v2291_v35, 8 }
  0xee   :  { %v2261_v63 = vpop.xlane.xlu1 %498 }
  0xf2   :  { %v2265_v4 = vpop.xlane.xlu1 %502 }
  0xf3   :  { %2875 = vst [vmem:[#allocation25_spill] sm:$0xff] %v2265_v4  ;;  %v887_v4 = vadd.s32 4294967280, %v2291_v35 }
  0xf6   :  { %v2269_v8 = vpop.xlane.xlu1 %506 }
  0xfa   :  { %v2273_v15 = vpop.xlane.xlu1 %510 }
  0xfb   :  { %2876 = vst [vmem:[#allocation26_spill] sm:$0xff] %v2273_v15 }
  0xfe   :  { %v2277_v18 = vpop.xlane.xlu1 %514 }
  0xff   :  { %2878 = vst [vmem:[#allocation28_spill] sm:$0xff] %v2277_v18 }
 0x102   :  { %v2281_v27 = vpop.xlane.xlu1 %518 }
 0x103   :  { %2880 = vst [vmem:[#allocation30_spill] sm:$0xff] %v2281_v27 }
 0x106   :  { %v2285_v29 = vpop.xlane.xlu1 %522 }
 0x107   :  { %2882 = vst [vmem:[#allocation32_spill] sm:$0xff] %v2285_v29 }
 0x10a   :  { %v2289_v33 = vpop.xlane.xlu1 %526 }
 0x10b   :  { %2884 = vst [vmem:[#allocation34_spill] sm:$0xff] %v2289_v33 }
 0x10e   :  { %1234 = vmax.xlane.f32.xlu1 %v1935_v0  ;;  %v2263_v0 = vpop.xlane.xlu0 %430 }
 0x112   :  { %1242 = vmax.xlane.f32.xlu1 %v1945_v2  ;;  %v2267_v2 = vpop.xlane.xlu0 %432 }
 0x116   :  { %v2271_v13 = vpop.xlane.xlu0 %436 }
 0x11a   :  { %v2275_v16 = vpop.xlane.xlu0 %440 }
 0x11b   :  { %2877 = vst [vmem:[#allocation27_spill] sm:$0xff] %v2275_v16 }
 0x11e   :  { %v2279_v24 = vpop.xlane.xlu0 %444 }
 0x11f   :  { %2879 = vst [vmem:[#allocation29_spill] sm:$0xff] %v2279_v24 }
 0x122   :  { %v2283_v28 = vpop.xlane.xlu0 %448 }
 0x123   :  { %2881 = vst [vmem:[#allocation31_spill] sm:$0xff] %v2283_v28 }
 0x126   :  { %v2287_v32 = vpop.xlane.xlu0 %454 }
 0x127   :  { %2883 = vst [vmem:[#allocation33_spill] sm:$0xff] %v2287_v32 }
 0x12a   :  { %v2293_v25 = vpop.xlane.xlu0 %456 }
 0x12b   :  { %2885 = vst [vmem:[#allocation35_spill] sm:$0xff] %v2293_v25 }
 0x12e   :  { %v2297_v37 = vpop.xlane.xlu0 %460 }
 0x12f   :  { %2886 = vst [vmem:[#allocation36_spill] sm:$0xff] %v2297_v37 }
 0x158   :  { %v1383_v17 = vpop.permute.xlu1 %1382 }
 0x159   :  { %v1385_v3 = vsel %vm1384_vm4, %v1383_v17, -3e+38  ;;  %v2306_v17 = vpop.xlane.xlu0 %464  ;;  %vm1566_vm4 = vcmask 1042433  }
 0x15a   :  { %v1387_v14 = vrot.slane %v1385_v3, 7  ;;  %v1391_v18 = vmax.f32 %v2194_v22, %v1385_v3  ;;  %2887 = vst [vmem:[#allocation37_spill] sm:$0xff] %v2306_v17 }
 0x15c   :  { %v1390_v29 = vmax.f32 %v2190_v20, %v1387_v14  ;;  %v1463_v36 = vpop.permute.xlu1 %1462 }
 0x15d   :  { %v1465_v28 = vsel %vm1464_vm5, %v1463_v36, -3e+38  ;;  %v2313_v3 = vpop.xlane.xlu0 %468  ;;  %vm1190_vm5 = vcmask 1044484  }
 0x15e   :  { %v1394_v33 = vrot.slane %v1390_v29, 1  ;;  %v1467_v27 = vrot.slane %v1465_v28, 1  ;;  %v2308_v15 = vmax.f32 %v1455_v34, %v1465_v28 }
 0x160   :  { %v2302_v32 = vmax.f32 %v2203_v26, %v1467_v27  ;;  %v1395_v25 = vsel %vm215_vm2, %v1391_v18, %v1394_v33 }
 0x161   :  { %1397 = vrot.lane.b32.xlu0 %v1395_v25, %s1870_s28  ;;  %v2315_v26 = vpop.xlane.xlu0 %472 }
 0x162   :  { %v1474_v14 = vrot.slane %v2302_v32, 7 }
 0x164   :  { %v1475_v36 = vsel %vm215_vm2, %v1474_v14, %v2308_v15  ;;  %v2330_v14 = vshrl.u32 %v530_v30, 7 }
 0x165   :  { %1477 = vrot.lane.b32.xlu1 %v1475_v36, %s1871_s22  ;;  %v2317_v27 = vpop.xlane.xlu0 %476 }
 0x166   :  { %2888 = vst [vmem:[#allocation38_spill] sm:$0xff] %v2330_v14  ;;  %v532_v17 = vsub.s32 2, %v2330_v14 }
 0x168   :  { %v533_v20 = vrot.slane %v1983_v12, %v532_v17 }
 0x169   :  { %v2319_v33 = vpop.xlane.xlu0 %480 }
 0x16d   :  { %v2321_v25 = vpop.xlane.xlu0 %484 }
 0x171   :  { %v2325_v34 = vpop.xlane.xlu0 %488 }
 0x175   :  { %v2328_v28 = vpop.xlane.xlu0 %492 }
 0x179   :  { %v2332_v36 = vpop.xlane.xlu0 %496 }
 0x17d   :  { %v2336_v22 = vpop.xlane.xlu0 %500 }
 0x180   :  { %1246 = vmax.xlane.f32.xlu0 %v1971_v9  ;;  %v1872_v9 = vmov 0  }
 0x181   :  { %1769 = vset.pattern.permute.xlu1 %v1872_v9  ;;  %1768 = vset.pattern.permute.xlu0 %v1872_v9 }
 0x184   :  { %1248 = vmax.xlane.f32.xlu0 %v1976_v10  ;;  %v2338_v10 = vpop.xlane.xlu0 %504 }
 0x185   :  { %2889 = vst [vmem:[#allocation39_spill] sm:$0xff] %v2338_v10  ;;  %v37_v10 = vld [vmem:[%s2844_s3 + $0x8] sm:$0xff] }
 0x188   :  { %v2340_v37 = vpop.xlane.xlu0 %508 }
 0x189   :  { %1238 = vmax.xlane.f32.xlu1 %v1959_v6  ;;  %2890 = vst [vmem:[#allocation40_spill] sm:$0xff] %v2340_v37 }
 0x18c   :  { %v2342_v6 = vpop.xlane.xlu0 %512 }
 0x18d   :  { %2891 = vst [vmem:[#allocation41_spill] sm:$0xff] %v2342_v6  ;;  %v38_v6 = vld [vmem:[%s2844_s3 + $0x10] sm:$0xff] }
 0x190   :  { %v2344_v30 = vpop.xlane.xlu0 %516 }
 0x191   :  { %2892 = vst [vmem:[#allocation42_spill] sm:$0xff] %v2344_v30 }
 0x194   :  { %v2346_v11 = vpop.xlane.xlu0 %520 }
 0x195   :  { %2893 = vst [vmem:[#allocation43_spill] sm:$0xff] %v2346_v11  ;;  %v1740_v11 = vpack.c.bf16 %v38_v6, %v37_v10  ;;  %v2376_v10 = vsub.s32 %v2291_v35, %v2330_v14 }
 0x197   :  { %1741 = vmatpush3.bf16.msra.mxu0 %v1740_v11  ;;  %v894_v11 = vadd.s32 4294967272, %v2291_v35 }
 0x198   :  { %v2348_v59 = vpop.xlane.xlu0 %524 }
 0x199   :  { %2894 = vst [vmem:[#allocation44_spill] sm:$0xff] %v2348_v59 }
 0x19a   :  { %540 = vbcast.lane.b32.xlu0 %v533_v20, 264 }
 0x19b   :  { %v1235_v37 = vpop.xlane.xlu1 %1234 }
 0x19c   :  { %v2350_v23 = vpop.xlane.xlu0 %528 }
 0x19d   :  { %2895 = vst [vmem:[#allocation45_spill] sm:$0xff] %v2350_v23  ;;  %v2896_v23 = vmov 0.0|0.0  }
 0x19e   :  { %1742 = vmatprep.subr.bf16.mxu0 %v2896_v23  ;;  %v2372_v23 = vsub.s32 %v887_v4, %v2330_v14  ;;  %v2388_v4 = vsub.s32 %v894_v11, %v2330_v14 }
 0x1a0   :  { %v1237_v12 = vpop.xlane.xlu0 %1236 }
 0x1a4   :  { %v1245_v17 = vpop.xlane.xlu0 %1244 }
 0x1d3   :  { %v1398_v21 = vpop.permute.xlu0 %1397 }
 0x1d4   :  { %v1400_v9 = vsel %vm1399_vm6, %v1398_v21, -3e+38 }
 0x1d5   :  { %v1402_v30 = vrot.slane %v1400_v9, 7  ;;  %v2362_v59 = vmax.f32 %v1391_v18, %v1400_v9  ;;  %v1243_v18 = vpop.xlane.xlu1 %1242 }
 0x1d7   :  { %v2359_v31 = vmax.f32 %v1390_v29, %v1402_v30  ;;  %v880_v29 = vadd.s32 4294967288, %v2291_v35  ;;  %v40_v30 = vld [vmem:[%s2844_s3 + $0x20] sm:$0xff] }
 0x1d9   :  { %v1409_v56 = vrot.slane %v2359_v31, 1 }
 0x1db   :  { %v1410_v21 = vsel %vm215_vm2, %v2362_v59, %v1409_v56  ;;  %v2379_v56 = vsub.s32 %v880_v29, %v2330_v14 }
 0x1dc   :  { %1412 = vrot.lane.b32.xlu1 %v1410_v21, %s1873_s0  ;;  %v1284_v21 = vrot.slane %v1243_v18, %v2376_v10 }
 0x1dd   :  { %v1288_v9 = vrot.slane %v1245_v17, %v2379_v56 }
 0x1df   :  { %v1289_v19 = vsel %vm885_vm8, %v1288_v9, %v1284_v21 }
 0x200   :  { %1240 = vmax.xlane.f32.xlu1 %v1964_v7  ;;  %v39_v7 = vld [vmem:[%s2844_s3 + $0x18] sm:$0xff] }
 0x201   :  { %v1743_v24 = vpack.c.bf16 %v40_v30, %v39_v7 }
 0x203   :  { %1744 = vmatpush3.bf16.msra.mxu0 %v1743_v24  ;;  %v1478_v24 = vpop.permute.xlu1 %1477 }
 0x204   :  { %v1480_v7 = vsel %vm1479_vm10, %v1478_v24, -3e+38 }
 0x205   :  { %v1482_v9 = vrot.slane %v1480_v7, 1 }
 0x20d   :  { %v1247_v6 = vpop.xlane.xlu0 %1246 }
 0x20e   :  { %v1293_v29 = vrot.slane %v1247_v6, %v2372_v23 }
 0x210   :  { %v1294_v11 = vsel %vm892_vm7, %v1293_v29, %v1289_v19  ;;  %v1265_v19 = vrot.slane %v1235_v37, %v2376_v10 }
 0x211   :  { %v1249_v50 = vpop.xlane.xlu0 %1248  ;;  %536 = vbcast.lane.b32.xlu1 %v533_v20, 256 }
 0x212   :  { %v1298_v16 = vrot.slane %v1249_v50, %v2388_v4  ;;  %v1269_v50 = vrot.slane %v1237_v12, %v2379_v56 }
 0x214   :  { %v1299_v14 = vsel %vm899_vm9, %v1298_v16, %v1294_v11 }
 0x215   :  { %544 = vbcast.lane.b32.xlu1 %v533_v20, 272  ;;  %v2397_v17 = vpop.permute.xlu0 %540 }
 0x216   :  { %v555_v18 = vmul.f32 %v2397_v17, %v2153_v40  ;;  %v1239_v6 = vpop.xlane.xlu1 %1238  ;;  %v2408_v40 = vmax.f32 %v2302_v32, %v1482_v9 }
 0x217   :  { %v1274_v16 = vrot.slane %v1239_v6, %v2372_v23 }
 0x218   :  { %v1489_v6 = vrot.slane %v2408_v40, 7 }
 0x219   :  { %548 = vbcast.lane.b32.xlu1 %v533_v20, 280  ;;  %v1270_v20 = vsel %vm885_vm8, %v1269_v50, %v1265_v19  ;;  %v2420_v50 = vmax.f32 %v2308_v15, %v1480_v7 }
 0x21a   :  { %v1275_v11 = vsel %vm892_vm7, %v1274_v16, %v1270_v20  ;;  %v591_v20 = vmul.f32 %v2397_v17, %v2317_v27 }
 0x21b   :  { %v1490_v9 = vsel %vm215_vm2, %v1489_v6, %v2420_v50 }
 0x21d   :  { %686 = vperm.xlu1 %1769, %v555_v18  }
 0x24e   :  { %v1413_v30 = vpop.permute.xlu1 %1412 }
 0x28d   :  { %v1241_v21 = vpop.xlane.xlu1 %1240 }
 0x28e   :  { %v1279_v29 = vrot.slane %v1241_v21, %v2388_v4 }
 0x290   :  { %v1280_v18 = vsel %vm899_vm9, %v1279_v29, %v1275_v11 }
 0x291   :  { %v2412_v24 = vpop.permute.xlu1 %536  ;;  %v1300_v12 = vsel %vm215_vm2, %v1299_v14, %v1280_v18  ;;  %v2898_v18 = vld [vmem:[#allocation17_spill] sm:$0xff] }
 0x292   :  { %1725 = vmatmul.mubr.msk.f32.vlgmr.msra.gmra.mrb[2].mxu0 %vm41_vm1, %v1300_v12  ;;  %v554_v37 = vmul.f32 %v2412_v24, %v2225_v38  ;;  %v558_v38 = vmul.f32 %v2412_v24, %v2163_v47  ;;  %v562_v16 = vmul.f32 %v2412_v24, %v2237_v51  ;;  %v563_v47 = vmul.f32 %v2397_v17, %v2241_v54 }
 0x293   :  { %v1415_v51 = vsel %vm1414_vm11, %v1413_v30, -3e+38  ;;  %v598_v11 = vmul.f32 %v2412_v24, %v2253_v58 }
 0x294   :  { %683 = vperm.xlu0 %1768, %v554_v37   ;;  %v1417_v54 = vrot.slane %v1415_v51, 7  ;;  %v2468_v27 = vmax.f32 %v2362_v59, %v1415_v51 }
 0x295   :  { %v2422_v32 = vpop.permute.xlu1 %544 }
 0x296   :  { %v556_v19 = vmul.f32 %v2422_v32, %v2157_v43  ;;  %v560_v7 = vmul.f32 %v2422_v32, %v2166_v48  ;;  %v559_v43 = vmul.f32 %v2397_v17, %v2229_v41  ;;  %v566_v48 = vmul.f32 %v2412_v24, %v2255_v60 }
 0x297   :  { %v590_v60 = vmul.f32 %v2412_v24, %v2235_v46  ;;  %v594_v46 = vmul.f32 %v2412_v24, %v2244_v1  ;;  %v596_v29 = vmul.f32 %v2422_v32, %v2249_v5  ;;  %v600_v58 = vmul.f32 %v2422_v32, %v2257_v61 }
 0x298   :  { %1492 = vrot.lane.b32.xlu0 %v1490_v9, %s1874_s11  ;;  %689 = vperm.xlu1 %1769, %v556_v19  }
 0x299   :  { %v2428_v14 = vpop.permute.xlu1 %548 }
 0x29a   :  { %v557_v15 = vmul.f32 %v2428_v14, %v2160_v45  ;;  %v561_v21 = vmul.f32 %v2428_v14, %v2233_v44  ;;  %v564_v45 = vmul.f32 %v2422_v32, %v2247_v55  ;;  %v565_v41 = vmul.f32 %v2428_v14, %v2251_v57 }
 0x29b   :  { %v587_v44 = vmul.f32 %v2397_v17, %v2313_v3  ;;  %v586_v55 = vmul.f32 %v2412_v24, %v2227_v39  ;;  %v2460_v57 = vmax.f32 %v2359_v31, %v1417_v54  ;;  %v592_v3 = vmul.f32 %v2422_v32, %v2239_v52 }
 0x29c   :  { %695 = vperm.xlu1 %1769, %v558_v38   ;;  %692 = vperm.xlu0 %1768, %v557_v15   ;;  %v588_v39 = vmul.f32 %v2422_v32, %v2231_v42  ;;  %v595_v52 = vmul.f32 %v2397_v17, %v2321_v25  ;;  %v567_v42 = vmul.f32 %v2397_v17, %v2259_v62 }
 0x29d   :  { %v1424_v30 = vrot.slane %v2460_v57, 1  ;;  %v589_v59 = vmul.f32 %v2428_v14, %v2315_v26  ;;  %v593_v1 = vmul.f32 %v2428_v14, %v2319_v33  ;;  %v599_v62 = vmul.f32 %v2397_v17, %v2328_v28  ;;  %v687_v12 = vpop.permute.xlu1 %686 }
 0x29e   :  { %v568_v25 = vmul.f32 %v2422_v32, %v2263_v0  ;;  %v570_v26 = vmul.f32 %v2412_v24, %v2169_v49  ;;  %v571_v33 = vmul.f32 %v2397_v17, %v2271_v13  ;;  %v597_v5 = vmul.f32 %v2428_v14, %v2325_v34  ;;  %v2897_v34 = vld [vmem:[#allocation27_spill] sm:$0xff] }
 0x29f   :  { %v1425_v31 = vsel %vm215_vm2, %v2468_v27, %v1424_v30  ;;  %v602_v0 = vmul.f32 %v2412_v24, %v2261_v63  ;;  %v603_v28 = vmul.f32 %v2397_v17, %v2336_v22  ;;  %v569_v49 = vmul.f32 %v2428_v14, %v2267_v2 }
 0x2a0   :  { %701 = vperm.xlu1 %1769, %v560_v7   ;;  %698 = vperm.xlu0 %1768, %v559_v43   ;;  %v574_v13 = vmul.f32 %v2412_v24, %v2179_v53  ;;  %v601_v61 = vmul.f32 %v2428_v14, %v2332_v36  ;;  %v606_v63 = vmul.f32 %v2412_v24, %v2269_v8 }
 0x2a1   :  { %v573_v22 = vmul.f32 %v2428_v14, %v2897_v34  ;;  %v578_v2 = vmul.f32 %v2412_v24, %v2898_v18  ;;  %v884_v36 = vrot.slane %v687_v12, %v2379_v56 }
 0x2a4   :  { %707 = vperm.xlu1 %1769, %v562_v16   ;;  %704 = vperm.xlu0 %1768, %v561_v21  }
 0x2a8   :  { %713 = vperm.xlu1 %1769, %v564_v45   ;;  %710 = vperm.xlu0 %1768, %v563_v47  }
 0x2ac   :  { %719 = vperm.xlu1 %1769, %v566_v48   ;;  %716 = vperm.xlu0 %1768, %v565_v41  }
 0x2b0   :  { %782 = vperm.xlu1 %1769, %v587_v44   ;;  %779 = vperm.xlu0 %1768, %v586_v55  }
 0x2b4   :  { %794 = vperm.xlu1 %1769, %v591_v20   ;;  %791 = vperm.xlu0 %1768, %v590_v60   ;;  %v2899_v60 = vld [vmem:[#allocation13_spill] sm:$0xff] }
 0x2b8   :  { %797 = vperm.xlu1 %1769, %v592_v3   ;;  %785 = vperm.xlu0 %1768, %v588_v39   ;;  %v572_v3 = vmul.f32 %v2422_v32, %v2899_v60 }
 0x2bc   :  { %1427 = vrot.lane.b32.xlu1 %v1425_v31, %s1875_s12  ;;  %803 = vperm.xlu0 %1768, %v594_v46  }
 0x2c0   :  { %806 = vperm.xlu1 %1769, %v595_v52   ;;  %722 = vperm.xlu0 %1768, %v567_v42   ;;  %v2900_v42 = vld [vmem:[#allocation29_spill] sm:$0xff] }
 0x2c4   :  { %788 = vperm.xlu1 %1769, %v589_v59   ;;  %800 = vperm.xlu0 %1768, %v593_v1   ;;  %v575_v59 = vmul.f32 %v2397_v17, %v2900_v42 }
 0x2c8   :  { %809 = vperm.xlu1 %1769, %v596_v29   ;;  %815 = vperm.xlu0 %1768, %v598_v11  }
 0x2cc   :  { %818 = vperm.xlu1 %1769, %v599_v62   ;;  %725 = vperm.xlu0 %1768, %v568_v25  }
 0x2d0   :  { %731 = vperm.xlu1 %1769, %v570_v26   ;;  %734 = vperm.xlu0 %1768, %v571_v33  }
 0x2d4   :  { %812 = vperm.xlu1 %1769, %v597_v5   ;;  %821 = vperm.xlu0 %1768, %v600_v58   ;;  %v2901_v5 = vld [vmem:[#allocation25_spill] sm:$0xff] }
 0x2d5   :  { %v604_v58 = vmul.f32 %v2422_v32, %v2901_v5  ;;  %v2905_v5 = vld [vmem:[#allocation19_spill] sm:$0xff] }
 0x2d8   :  { %827 = vperm.xlu1 %1769, %v602_v0   ;;  %830 = vperm.xlu0 %1768, %v603_v28  }
 0x2dc   :  { %728 = vperm.xlu1 %1769, %v569_v49  }
 0x2e0   :  { %743 = vperm.xlu1 %1769, %v574_v13  }
 0x2e4   :  { %824 = vperm.xlu1 %1769, %v601_v61  }
 0x2e8   :  { %839 = vperm.xlu1 %1769, %v606_v63   ;;  %v2902_v63 = vld [vmem:[#allocation40_spill] sm:$0xff] }
 0x2e9   :  { %v607_v34 = vmul.f32 %v2397_v17, %v2902_v63 }
 0x2ec   :  { %740 = vperm.xlu1 %1769, %v573_v22  }
 0x2f0   :  { %755 = vperm.xlu1 %1769, %v578_v2  }
 0x313   :  { %v684_v37 = vpop.permute.xlu0 %683 }
 0x314   :  { %v879_v53 = vrot.slane %v684_v37, %v2376_v10 }
 0x316   :  { %v886_v38 = vsel %vm885_vm8, %v884_v36, %v879_v53  ;;  %v2903_v36 = vld [vmem:[#allocation14_spill] sm:$0xff] }
 0x317   :  { %v1493_v6 = vpop.permute.xlu0 %1492  ;;  %v690_v19 = vpop.permute.xlu1 %689 }
 0x318   :  { %v1495_v8 = vsel %vm1494_vm12, %v1493_v6, -3e+38  ;;  %v891_v9 = vrot.slane %v690_v19, %v2372_v23  ;;  %v576_v6 = vmul.f32 %v2422_v32, %v2903_v36 }
 0x319   :  { %v1497_v15 = vrot.slane %v1495_v8, 1  ;;  %v2525_v47 = vmax.f32 %v2420_v50, %v1495_v8 }
 0x31a   :  { %v893_v7 = vsel %vm892_vm7, %v891_v9, %v886_v38 }
 0x31b   :  { %v2521_v43 = vmax.f32 %v2408_v40, %v1497_v15  ;;  %v693_v16 = vpop.permute.xlu0 %692  ;;  %v696_v21 = vpop.permute.xlu1 %695 }
 0x31c   :  { %v898_v45 = vrot.slane %v693_v16, %v2388_v4  ;;  %v904_v54 = vrot.slane %v696_v21, %v2376_v10 }
 0x31d   :  { %v1504_v48 = vrot.slane %v2521_v43, 7 }
 0x31e   :  { %v900_v41 = vsel %vm899_vm9, %v898_v45, %v893_v7  ;;  %v2904_v7 = vld [vmem:[#allocation22_spill] sm:$0xff] }
 0x31f   :  { %v699_v51 = vpop.permute.xlu0 %698  ;;  %v702_v44 = vpop.permute.xlu1 %701  ;;  %v1505_v55 = vsel %vm215_vm2, %v1504_v48, %v2525_v47  ;;  %v579_v16 = vmul.f32 %v2397_v17, %v2904_v7 }
 0x320   :  { %v908_v40 = vrot.slane %v699_v51, %v2379_v56  ;;  %v913_v20 = vrot.slane %v702_v44, %v2372_v23  ;;  %1507 = vrot.lane.b32.xlu0 %v1505_v55, %s1876_s13 }
 0x322   :  { %v909_v50 = vsel %vm885_vm8, %v908_v40, %v904_v54 }
 0x323   :  { %v914_v39 = vsel %vm892_vm7, %v913_v20, %v909_v50  ;;  %v705_v30 = vpop.permute.xlu0 %704  ;;  %v708_v46 = vpop.permute.xlu1 %707 }
 0x324   :  { %v918_v31 = vrot.slane %v705_v30, %v2388_v4  ;;  %737 = vperm.xlu0 %1768, %v572_v3   ;;  %v923_v62 = vrot.slane %v708_v46, %v2376_v10 }
 0x326   :  { %v919_v52 = vsel %vm899_vm9, %v918_v31, %v914_v39 }
 0x327   :  { %v1186_v1 = vsel %vm215_vm2, %v919_v52, %v900_v41  ;;  %v711_v29 = vpop.permute.xlu0 %710  ;;  %v714_v11 = vpop.permute.xlu1 %713 }
 0x328   :  { %v927_v25 = vrot.slane %v711_v29, %v2379_v56  ;;  %v932_v26 = vrot.slane %v714_v11, %v2372_v23  ;;  %746 = vperm.xlu0 %1768, %v575_v59  }
 0x32a   :  { %v928_v33 = vsel %vm885_vm8, %v927_v25, %v923_v62 }
 0x32b   :  { %v933_v0 = vsel %vm892_vm7, %v932_v26, %v928_v33  ;;  %v717_v28 = vpop.permute.xlu0 %716  ;;  %v720_v49 = vpop.permute.xlu1 %719 }
 0x32c   :  { %v937_v13 = vrot.slane %v717_v28, %v2388_v4  ;;  %833 = vperm.xlu0 %1768, %v604_v58   ;;  %v942_v39 = vrot.slane %v720_v49, %v2376_v10 }
 0x32e   :  { %v938_v61 = vsel %vm899_vm9, %v937_v13, %v933_v0 }
 0x32f   :  { %v2555_v22 = vsel %vm222_vm3, %v938_v61, %v1186_v1  ;;  %v780_v18 = vpop.permute.xlu0 %779  ;;  %v783_v2 = vpop.permute.xlu1 %782  ;;  %v2906_v61 = vld [vmem:[#allocation21_spill] sm:$0xff] }
 0x330   :  { %v1037_v12 = vrot.slane %v780_v18, %v2376_v10  ;;  %v1041_v37 = vrot.slane %v783_v2, %v2379_v56  ;;  %842 = vperm.xlu0 %1768, %v607_v34   ;;  %v2907_v34 = vld [vmem:[#allocation15_spill] sm:$0xff] }
 0x331   :  { %v2908_v18 = vrot.slane %v2907_v34, 1 }
 0x332   :  { %v1042_v53 = vsel %vm885_vm8, %v1041_v37, %v1037_v12 }
 0x333   :  { %v792_v19 = vpop.permute.xlu0 %791  ;;  %v795_v8 = vpop.permute.xlu1 %794 }
 0x334   :  { %v1056_v9 = vrot.slane %v792_v19, %v2376_v10  ;;  %v1060_v38 = vrot.slane %v795_v8, %v2379_v56  ;;  %749 = vperm.xlu0 %1768, %v576_v6  }
 0x336   :  { %v1061_v15 = vsel %vm885_vm8, %v1060_v38, %v1056_v9 }
 0x337   :  { %v786_v21 = vpop.permute.xlu0 %785  ;;  %v798_v45 = vpop.permute.xlu1 %797 }
 0x338   :  { %v1046_v48 = vrot.slane %v786_v21, %v2372_v23  ;;  %v1065_v41 = vrot.slane %v798_v45, %v2372_v23  ;;  %758 = vperm.xlu0 %1768, %v579_v16  }
 0x33a   :  { %v1047_v51 = vsel %vm892_vm7, %v1046_v48, %v1042_v53  ;;  %v1066_v44 = vsel %vm892_vm7, %v1065_v41, %v1061_v15  ;;  %v2909_v15 = vld [vmem:[#allocation16_spill] sm:$0xff] }
 0x33b   :  { %v804_v55 = vpop.permute.xlu0 %803  ;;  %v1428_v54 = vpop.permute.xlu1 %1427  ;;  %v2910_v7 = vrot.slane %v2909_v15, 1 }
 0x33c   :  { %v1430_v40 = vsel %vm1429_vm13, %v1428_v54, -3e+38  ;;  %v1075_v30 = vrot.slane %v804_v55, %v2376_v10  ;;  %vm1194_vm13 = vcmask 1046534  }
 0x33d   :  { %v1432_v20 = vrot.slane %v1430_v40, 7  ;;  %v1436_v50 = vmax.f32 %v2468_v27, %v1430_v40 }
 0x33f   :  { %v723_v60 = vpop.permute.xlu0 %722  ;;  %v807_v3 = vpop.permute.xlu1 %806  ;;  %v1435_v59 = vmax.f32 %v2460_v57, %v1432_v20  ;;  %v1440_v1 = vrot.slane %v1436_v50, 1 }
 0x340   :  { %v946_v46 = vrot.slane %v723_v60, %v2379_v56  ;;  %v1079_v31 = vrot.slane %v807_v3, %v2379_v56 }
 0x341   :  { %v1439_v33 = vrot.slane %v1435_v59, 1  ;;  %v1444_v58 = vadd.f32 %v1440_v1, %v2905_v5 }
 0x342   :  { %v947_v52 = vsel %vm885_vm8, %v946_v46, %v942_v39  ;;  %v1080_v42 = vsel %vm885_vm8, %v1079_v31, %v1075_v30 }
 0x343   :  { %v801_v29 = vpop.permute.xlu0 %800  ;;  %v789_v11 = vpop.permute.xlu1 %788  ;;  %v1443_v63 = vadd.f32 %v1439_v33, %v2906_v61  ;;  %v2591_v2 = vsub.f32 %v1444_v58, %v2908_v18  ;;  %v2911_v58 = vld [vmem:[#allocation26_spill] sm:$0xff]  ;;  %v2916_v18 = vld [vmem:[#allocation44_spill] sm:$0xff] }
 0x344   :  { %v1070_v27 = vrot.slane %v801_v29, %v2388_v4  ;;  %v1051_v62 = vrot.slane %v789_v11, %v2388_v4 }
 0x345   :  { %v2600_v16 = vsub.f32 %v1443_v63, %v2910_v7  ;;  %v1527_v21 = vrot.slane %v2591_v2, 7  ;;  %v2915_v63 = vld [vmem:[#allocation30_spill] sm:$0xff] }
 0x346   :  { %v1071_v25 = vsel %vm899_vm9, %v1070_v27, %v1066_v44  ;;  %v1052_v26 = vsel %vm899_vm9, %v1051_v62, %v1047_v51  ;;  %v612_v34 = vmul.f32 %v2422_v32, %v2915_v63  ;;  %v2925_v63 = vld [vmem:[#allocation41_spill] sm:$0xff] }
 0x347   :  { %v1198_v0 = vsel %vm215_vm2, %v1071_v25, %v1052_v26  ;;  %v816_v28 = vpop.permute.xlu0 %815  ;;  %v810_v49 = vpop.permute.xlu1 %809  ;;  %v1528_v55 = vsel %vm215_vm2, %v1527_v21, %v2600_v16  ;;  %v2919_v21 = vld [vmem:[#allocation20_spill] sm:$0xff] }
 0x348   :  { %v1084_v57 = vrot.slane %v810_v49, %v2372_v23  ;;  %v1094_v53 = vrot.slane %v816_v28, %v2376_v10  ;;  %v1531_v60 = vsel %vm1530_vm14, %v1528_v55, -inf  ;;  %v2912_v28 = vld [vmem:[#allocation42_spill] sm:$0xff] }
 0x349   :  { %v611_v49 = vmul.f32 %v2397_v17, %v2912_v28 }
 0x34a   :  { %v1085_v13 = vsel %vm892_vm7, %v1084_v57, %v1080_v42 }
 0x34b   :  { %v726_v12 = vpop.permute.xlu0 %725  ;;  %v819_v37 = vpop.permute.xlu1 %818 }
 0x34c   :  { %v951_v36 = vrot.slane %v726_v12, %v2372_v23  ;;  %v1098_v6 = vrot.slane %v819_v37, %v2379_v56  ;;  %v615_v12 = vmul.f32 %v2397_v17, %v2916_v18  ;;  %v2917_v37 = vld [vmem:[#allocation35_spill] sm:$0xff]  ;;  %v2926_v18 = vld [vmem:[#allocation32_spill] sm:$0xff] }
 0x34e   :  { %v952_v19 = vsel %vm892_vm7, %v951_v36, %v947_v52  ;;  %v1099_v8 = vsel %vm885_vm8, %v1098_v6, %v1094_v53  ;;  %v581_v53 = vmul.f32 %v2428_v14, %v2917_v37  ;;  %v2918_v36 = vld [vmem:[#allocation34_spill] sm:$0xff]  ;;  %v2927_v37 = vld [vmem:[#allocation24_spill] sm:$0xff] }
 0x34f   :  { %v735_v9 = vpop.permute.xlu0 %734  ;;  %v732_v38 = vpop.permute.xlu1 %731  ;;  %v616_v6 = vmul.f32 %v2422_v32, %v2918_v36  ;;  %v2928_v36 = vld [vmem:[#allocation43_spill] sm:$0xff] }
 0x350   :  { %v965_v45 = vrot.slane %v735_v9, %v2379_v56  ;;  %v961_v48 = vrot.slane %v732_v38, %v2376_v10 }
 0x352   :  { %v2606_v41 = vsel %vm885_vm8, %v965_v45, %v961_v48 }
 0x353   :  { %v822_v51 = vpop.permute.xlu0 %821  ;;  %v813_v44 = vpop.permute.xlu1 %812 }
 0x354   :  { %v1103_v54 = vrot.slane %v822_v51, %v2372_v23  ;;  %v1089_v40 = vrot.slane %v813_v44, %v2388_v4  ;;  %v2920_v51 = vld [vmem:[#allocation18_spill] sm:$0xff] }
 0x356   :  { %v1104_v20 = vsel %vm892_vm7, %v1103_v54, %v1099_v8  ;;  %v1090_v50 = vsel %vm899_vm9, %v1089_v40, %v1085_v13  ;;  %v2914_v13 = vld [vmem:[#allocation36_spill] sm:$0xff] }
 0x357   :  { %v1199_v3 = vsel %vm222_vm3, %v1090_v50, %v1198_v0  ;;  %v831_v39 = vpop.permute.xlu0 %830  ;;  %1532 = vmax.xlane.f32.xlu0 %v1531_v60  ;;  %v828_v30 = vpop.permute.xlu1 %827  ;;  %v608_v0 = vmul.f32 %v2422_v32, %v2911_v58  ;;  %v583_v61 = vmul.f32 %v2397_v17, %v2914_v13  ;;  %v2924_v13 = vld [vmem:[#allocation23_spill] sm:$0xff] }
 0x358   :  { %v1117_v46 = vrot.slane %v831_v39, %v2379_v56  ;;  %v1113_v31 = vrot.slane %v828_v30, %v2376_v10 }
 0x35a   :  { %v1118_v52 = vsel %vm885_vm8, %v1117_v46, %v1113_v31 }
 0x35b   :  { %v729_v42 = vpop.permute.xlu1 %728 }
 0x35c   :  { %v956_v59 = vrot.slane %v729_v42, %v2388_v4 }
 0x35e   :  { %v957_v1 = vsel %vm899_vm9, %v956_v59, %v952_v19 }
 0x35f   :  { %v1189_v29 = vsel %vm1188_vm15, %v957_v1, %v2555_v22  ;;  %v744_v11 = vpop.permute.xlu1 %743  ;;  %v2913_v22 = vld [vmem:[#allocation33_spill] sm:$0xff] }
 0x360   :  { %v580_v57 = vmul.f32 %v2422_v32, %v2913_v22  ;;  %v980_v30 = vrot.slane %v744_v11, %v2376_v10  ;;  %v2923_v22 = vld [vmem:[#allocation31_spill] sm:$0xff] }
 0x363   :  { %v825_v27 = vpop.permute.xlu1 %824 }
 0x364   :  { %v1108_v62 = vrot.slane %v825_v27, %v2388_v4 }
 0x365   :  { %v2623_v25 = vpop.f32.mrb[2].mxu0 }
 0x366   :  { %v1109_v26 = vsel %vm899_vm9, %v1108_v62, %v1104_v20  ;;  %v1726_v33 = vpop.f32.mrb[3].mxu0 }
 0x367   :  { %v2626_v5 = vsel %vm1188_vm15, %v1109_v26, %v1199_v3  ;;  %v840_v48 = vpop.permute.xlu1 %839  ;;  %v2921_v26 = vld [vmem:[#allocation39_spill] sm:$0xff] }
 0x368   :  { %v1132_v33 = vrot.slane %v840_v48, %v2376_v10 }
 0x36d   :  { %845 = vperm.xlu0 %1768, %v608_v0   ;;  %v2922_v0 = vld [vmem:[#allocation28_spill] sm:$0xff] }
 0x36e   :  { %v610_v28 = vmul.f32 %v2412_v24, %v2922_v0 }
 0x371   :  { %854 = vperm.xlu0 %1768, %v611_v49  }
 0x375   :  { %761 = vperm.xlu0 %1768, %v580_v57   ;;  %v577_v57 = vmul.f32 %v2428_v14, %v2923_v22 }
 0x379   :  { %770 = vperm.xlu0 %1768, %v583_v61   ;;  %v582_v61 = vmul.f32 %v2412_v24, %v2924_v13 }
 0x37d   :  { %857 = vperm.xlu0 %1768, %v612_v34   ;;  %v609_v34 = vmul.f32 %v2428_v14, %v2925_v63 }
 0x381   :  { %866 = vperm.xlu0 %1768, %v615_v12   ;;  %v614_v12 = vmul.f32 %v2412_v24, %v2926_v18 }
 0x385   :  { %764 = vperm.xlu0 %1768, %v581_v53   ;;  %v584_v53 = vmul.f32 %v2422_v32, %v2927_v37 }
 0x389   :  { %869 = vperm.xlu0 %1768, %v616_v6   ;;  %v613_v6 = vmul.f32 %v2428_v14, %v2928_v36 }
 0x392   :  { %v1508_v19 = vpop.permute.xlu0 %1507 }
 0x393   :  { %v1510_v8 = vsel %vm1509_vm0, %v1508_v19, -3e+38  ;;  %v2929_v19 = vld [vmem:[#allocation37_spill] sm:$0xff] }
 0x394   :  { %v1512_v9 = vrot.slane %v1510_v8, 1  ;;  %v1515_v38 = vmax.f32 %v2525_v47, %v1510_v8  ;;  %v741_v47 = vpop.permute.xlu1 %740  ;;  %v585_v8 = vmul.f32 %v2428_v14, %v2929_v19 }
 0x395   :  { %v975_v50 = vrot.slane %v741_v47, %v2388_v4 }
 0x396   :  { %v1516_v15 = vmax.f32 %v2521_v43, %v1512_v9  ;;  %v1519_v7 = vrot.slane %v1515_v38, 7 }
 0x398   :  { %v1520_v17 = vrot.slane %v1516_v15, 7  ;;  %v2651_v44 = vadd.f32 %v1519_v7, %v2920_v51 }
 0x39a   :  { %v2648_v45 = vadd.f32 %v1520_v17, %v2919_v21 }
 0x39c   :  { %v1563_v55 = vrot.slane %v2648_v45, 7 }
 0x39e   :  { %v1564_v54 = vsel %vm222_vm3, %v1563_v55, %v2651_v44 }
 0x39f   :  { %v1567_v40 = vsel %vm1566_vm4, %v1564_v54, -inf }
 0x3a0   :  { %1568 = vmax.xlane.f32.xlu1 %v1567_v40 }
 0x3a3   :  { %v738_v43 = vpop.permute.xlu0 %737 }
 0x3a4   :  { %v970_v20 = vrot.slane %v738_v43, %v2372_v23 }
 0x3a6   :  { %v971_v60 = vsel %vm892_vm7, %v970_v20, %v2606_v41  ;;  %v605_v41 = vmul.f32 %v2428_v14, %v2921_v26  ;;  %v756_v20 = vpop.permute.xlu1 %755 }
 0x3a7   :  { %v976_v3 = vsel %vm899_vm9, %v975_v50, %v971_v60  ;;  %v747_v39 = vpop.permute.xlu0 %746 }
 0x3a8   :  { %v984_v46 = vrot.slane %v747_v39, %v2379_v56  ;;  %v2665_v31 = vsel %vm1190_vm5, %v976_v3, %v1189_v29 }
 0x3aa   :  { %v985_v42 = vsel %vm885_vm8, %v984_v46, %v980_v30 }
 0x3ab   :  { %v834_v59 = vpop.permute.xlu0 %833 }
 0x3ac   :  { %v1122_v1 = vrot.slane %v834_v59, %v2372_v23 }
 0x3ae   :  { %v1123_v27 = vsel %vm892_vm7, %v1122_v1, %v1118_v52 }
 0x3af   :  { %v843_v62 = vpop.permute.xlu0 %842 }
 0x3b0   :  { %v1136_v11 = vrot.slane %v843_v62, %v2379_v56 }
 0x3b1   :  { %836 = vperm.xlu1 %1769, %v605_v41  }
 0x3b2   :  { %v1137_v58 = vsel %vm885_vm8, %v1136_v11, %v1132_v33 }
 0x3b3   :  { %v750_v29 = vpop.permute.xlu0 %749 }
 0x3b4   :  { %v989_v49 = vrot.slane %v750_v29, %v2372_v23 }
 0x3b5   :  { %851 = vperm.xlu1 %1769, %v610_v28  }
 0x3b6   :  { %v2679_v52 = vsel %vm892_vm7, %v989_v49, %v985_v42  ;;  %v999_v49 = vrot.slane %v756_v20, %v2376_v10 }
 0x3b7   :  { %v759_v9 = vpop.permute.xlu0 %758 }
 0x3b9   :  { %752 = vperm.xlu1 %1769, %v577_v57  }
 0x3bd   :  { %767 = vperm.xlu1 %1769, %v582_v61  }
 0x3c1   :  { %848 = vperm.xlu1 %1769, %v609_v34  }
 0x3c5   :  { %863 = vperm.xlu1 %1769, %v614_v12  }
 0x3c9   :  { %773 = vperm.xlu1 %1769, %v584_v53  }
 0x3cd   :  { %860 = vperm.xlu1 %1769, %v613_v6  }
 0x3d1   :  { %776 = vperm.xlu1 %1769, %v585_v8  }
 0x3e4   :  { %v1533_v38 = vpop.xlane.xlu0 %1532 }
 0x3e5   :  { %v1535_v15 = vrot.slane %v1533_v38, 1  ;;  %vm1538_vm6 = vcmp.eq.f32.partialorder %v2600_v16, %v1533_v38 }
 0x3e6   :  { %v1540_v32 = vsel %vm1538_vm6, %v2291_v35, 128 }
 0x3e7   :  { %vm1539_vm10 = vcmp.eq.f32.partialorder %v2591_v2, %v1535_v15  ;;  %v2930_v2 = vld [vmem:[#allocation12_spill] sm:$0xff] }
 0x3e8   :  { %v1541_v24 = vsel %vm1539_vm10, %v2291_v35, 128 }
 0x3e9   :  { %v1542_v7 = vrot.slane %v1541_v24, 7 }
 0x3eb   :  { %v1543_v17 = vsel %vm215_vm2, %v1542_v7, %v1540_v32 }
 0x3ec   :  { %v846_v21 = vpop.permute.xlu0 %845  ;;  %v2701_v48 = vsel %vm1530_vm14, %v1543_v17, 2147483647  ;;  %vm1196_vm14 = vcmask 1047559  }
 0x3ed   :  { %v1141_v51 = vrot.slane %v846_v21, %v2372_v23  ;;  %v1546_v54 = vshra.s32 %v2701_v48, 16 }
 0x3ef   :  { %v1142_v55 = vsel %vm892_vm7, %v1141_v51, %v1137_v58  ;;  %v2706_v16 = vcvt.s32.f32 %v1546_v54 }
 0x3f0   :  { %v855_v40 = vpop.permute.xlu0 %854 }
 0x3f4   :  { %v762_v47 = vpop.permute.xlu0 %761 }
 0x3f5   :  { %1549 = vmin.xlane.f32.xlu1 %v2706_v16 }
 0x3f8   :  { %v2711_v43 = vpop.permute.xlu0 %770 }
 0x3fc   :  { %v858_v50 = vpop.permute.xlu0 %857 }
 0x3fd   :  { %v1160_v0 = vrot.slane %v858_v50, %v2372_v23 }
 0x400   :  { %v867_v39 = vpop.permute.xlu0 %866 }
 0x401   :  { %v1174_v15 = vrot.slane %v867_v39, %v2379_v56 }
 0x404   :  { %v765_v11 = vpop.permute.xlu0 %764 }
 0x405   :  { %v1013_v22 = vrot.slane %v765_v11, %v2388_v4 }
 0x406   :  { %1213 = vrot.lane.b32.xlu1 %v2930_v2, %s1870_s28 }
 0x42d   :  { %v1569_v60 = vpop.xlane.xlu1 %1568 }
 0x42e   :  { %v1571_v3 = vrot.slane %v1569_v60, 1  ;;  %vm1574_vm11 = vcmp.eq.f32.partialorder %v2651_v44, %v1569_v60 }
 0x42f   :  { %v1576_v1 = vsel %vm1574_vm11, %v2291_v35, 128 }
 0x430   :  { %vm1575_vm12 = vcmp.eq.f32.partialorder %v2648_v45, %v1571_v3  ;;  %v1155_v45 = vrot.slane %v855_v40, %v2379_v56 }
 0x431   :  { %v1577_v30 = vsel %vm1575_vm12, %v2291_v35, 128  ;;  %v837_v46 = vpop.permute.xlu1 %836  ;;  %v1003_v35 = vrot.slane %v759_v9, %v2379_v56 }
 0x432   :  { %v1578_v42 = vrot.slane %v1577_v30, 7  ;;  %v1127_v59 = vrot.slane %v837_v46, %v2388_v4  ;;  %v1545_v30 = vand.u32 65535, %v2701_v48 }
 0x433   :  { %v1004_v63 = vsel %vm885_vm8, %v1003_v35, %v999_v49 }
 0x434   :  { %v1579_v62 = vsel %vm222_vm3, %v1578_v42, %v1576_v1  ;;  %v1128_v26 = vsel %vm899_vm9, %v1127_v59, %v1123_v27  ;;  %v1008_v27 = vrot.slane %v762_v47, %v2372_v23  ;;  %vm1192_vm3 = vcmask 1045509   ;;  %v870_v59 = vpop.permute.xlu0 %869 }
 0x435   :  { %v1201_v41 = vsel %vm1190_vm5, %v1128_v26, %v2626_v5  ;;  %v852_v33 = vpop.permute.xlu1 %851  ;;  %v2723_v44 = vsel %vm1566_vm4, %v1579_v62, 2147483647  ;;  %v1022_v47 = vrot.slane %v2711_v43, %v2379_v56  ;;  %v1547_v42 = vcvt.s32.f32 %v1545_v30 }
 0x436   :  { %v1151_v58 = vrot.slane %v852_v33, %v2376_v10  ;;  %v1582_v29 = vshra.s32 %v2723_v44, 16  ;;  %v1009_v34 = vsel %vm892_vm7, %v1008_v27, %v1004_v63  ;;  %v1581_v1 = vand.u32 65535, %v2723_v44  ;;  %v2932_v44 = vld [vmem:[#allocation38_spill] sm:$0xff] }
 0x437   :  { %v1014_v12 = vsel %vm899_vm9, %v1013_v22, %v1009_v34  ;;  %v1179_v33 = vrot.slane %v870_v59, %v2372_v23  ;;  %v1252_v35 = vsub.s32 3, %v2932_v44 }
 0x438   :  { %v1156_v28 = vsel %vm885_vm8, %v1155_v45, %v1151_v58  ;;  %v1584_v5 = vcvt.s32.f32 %v1582_v29  ;;  %v1583_v26 = vcvt.s32.f32 %v1581_v1 }
 0x439   :  { %v753_v57 = vpop.permute.xlu1 %752  ;;  %v1161_v13 = vsel %vm892_vm7, %v1160_v0, %v1156_v28  ;;  %v1770_v0 = vld [vmem:[%s2844_s3] sm:$0xff] }
 0x43a   :  { %v994_v61 = vrot.slane %v753_v57, %v2388_v4  ;;  %1585 = vmin.xlane.f32.xlu0 %v1584_v5  ;;  %v1253_v27 = vrot.slane %v1770_v0, %v1252_v35 }
 0x43c   :  { %v995_v18 = vsel %vm899_vm9, %v994_v61, %v2679_v52 }
 0x43d   :  { %v768_v37 = vpop.permute.xlu1 %767  ;;  %v1193_v53 = vsel %vm1192_vm3, %v995_v18, %v2665_v31  ;;  %v2931_v31 = vld [vmem:[#allocation45_spill] sm:$0xff] }
 0x43e   :  { %v1195_v36 = vsel %vm1194_vm13, %v1014_v12, %v1193_v53  ;;  %v617_v21 = vmul.f32 %v2428_v14, %v2931_v31  ;;  %v1018_v2 = vrot.slane %v768_v37, %v2376_v10 }
 0x440   :  { %v1023_v50 = vsel %vm885_vm8, %v1022_v47, %v1018_v2 }
 0x441   :  { %v849_v6 = vpop.permute.xlu1 %848 }
 0x442   :  { %v1146_v19 = vrot.slane %v849_v6, %v2388_v4 }
 0x444   :  { %v1147_v8 = vsel %vm899_vm9, %v1146_v19, %v1142_v55 }
 0x445   :  { %v864_v9 = vpop.permute.xlu1 %863  ;;  %v1202_v38 = vsel %vm1192_vm3, %v1147_v8, %v1201_v41 }
 0x446   :  { %v1170_v24 = vrot.slane %v864_v9, %v2376_v10 }
 0x448   :  { %v1175_v52 = vsel %vm885_vm8, %v1174_v15, %v1170_v24 }
 0x449   :  { %v774_v7 = vpop.permute.xlu1 %773  ;;  %v1180_v11 = vsel %vm892_vm7, %v1179_v33, %v1175_v52 }
 0x44a   :  { %v1027_v40 = vrot.slane %v774_v7, %v2372_v23 }
 0x44c   :  { %v1028_v60 = vsel %vm892_vm7, %v1027_v40, %v1023_v50 }
 0x44d   :  { %v861_v32 = vpop.permute.xlu1 %860 }
 0x44e   :  { %v1165_v17 = vrot.slane %v861_v32, %v2388_v4 }
 0x450   :  { %v1166_v51 = vsel %vm899_vm9, %v1165_v17, %v1161_v13  ;;  %872 = vperm.xlu0 %1768, %v617_v21  }
 0x451   :  { %v1203_v55 = vsel %vm1194_vm13, %v1166_v51, %v1202_v38  ;;  %v777_v54 = vpop.permute.xlu1 %776 }
 0x452   :  { %v1032_v20 = vrot.slane %v777_v54, %v2388_v4 }
 0x454   :  { %v1033_v14 = vsel %vm899_vm9, %v1032_v20, %v1028_v60 }
 0x455   :  { %v1197_v3 = vsel %vm1196_vm14, %v1033_v14, %v1195_v36 }
 0x456   :  { %v1207_v39 = vsel %vm41_vm1, %v1197_v3, 0.0 }
 0x46f   :  { %1208 = vadd.xlane.f32.xlu0 %v1207_v39 }
 0x482   :  { %v1550_v46 = vpop.xlane.xlu1 %1549 }
 0x483   :  { %vm1551_vm15 = vcmp.eq.f32.partialorder %v2706_v16, %v1550_v46 }
 0x484   :  { %v1552_v56 = vsel %vm1551_vm15, %v1547_v42, inf }
 0x485   :  { %1553 = vmin.xlane.f32.xlu0 %v1552_v56 }
 0x486   :  { %v1214_v43 = vpop.permute.xlu1 %1213 }
 0x487   :  { %1749 = vpush %v1214_v43 }
 0x4c7   :  { %v1586_v62 = vpop.xlane.xlu0 %1585 }
 0x4c8   :  { %vm1587_vm8 = vcmp.eq.f32.partialorder %v1584_v5, %v1586_v62 }
 0x4c9   :  { %v1588_v41 = vsel %vm1587_vm8, %v1583_v26, inf }
 0x4ca   :  { %1589 = vmin.xlane.f32.xlu0 %v1588_v41 }
 0x4cf   :  { %v873_v45 = vpop.permute.xlu0 %872 }
 0x4d0   :  { %v1184_v48 = vrot.slane %v873_v45, %v2388_v4 }
 0x4d2   :  { %v1185_v16 = vsel %vm899_vm9, %v1184_v48, %v1180_v11 }
 0x4d3   :  { %v1204_v58 = vsel %vm1196_vm14, %v1185_v16, %v1203_v55 }
 0x4d4   :  { %v1210_v29 = vsel %vm41_vm1, %v1204_v58, 0.0 }
 0x4d5   :  { %1211 = vadd.xlane.f32.xlu1 %v1210_v29 }
 0x4e6   :  { %1302 = vrot.lane.b32.xlu1 %v1253_v27, %s1877_s16 }
 0x4e7   :  { %1782 = shalt.err (!%p1779_p4)
}
 0x4e8   :  { %s1783_s3 = scalar_lea.hbm %s2846_s5, 32 }
 0x4e9   :  { %p1784_p5 = scmp.ne.s32.totalorder %s2846_s5, %s1783_s3  ;;  %p1787_p6 = scmp.lt.u32.totalorder %s1783_s3, %s2846_s5 }
 0x4eb   :  { %p1789_p7 = pnand %p1787_p6, %p1784_p5 }
 0x4ed   :  { %1792 = shalt.err (!%p1789_p7)
}
 0x4ee   :  { %1616 = dma.vmem_to_hbm [thread:$0]  %s1614_s17, 32, %s2846_s5, [#allocation5]  }
 0x4ef   :  { %s1793_s0 = scalar_lea.vmem %s1604_s19, 32  ;;  %p1798_p9 = scmp.lt.s32.totalorder %s1604_s19, %s1604_s19 }
 0x4f0   :  { %p1794_p8 = scmp.ne.s32.totalorder %s1604_s19, %s1793_s0  ;;  %p1799_p10 = scmp.lt.s32.totalorder %s1793_s0, %s1793_s0 }
 0x4f2   :  { %p1800_p11 = por %p1799_p10, %p1798_p9 }
 0x4f4   :  { %p1801_p12 = pnand %p1800_p11, %p1794_p8 }
 0x4f6   :  { %1804 = shalt.err (!%p1801_p12)
}
 0x4f7   :  { %s1805_s30 = scalar_lea.hbm %s2845_s4, 32 }
 0x4f8   :  { %p1806_p13 = scmp.ne.s32.totalorder %s2845_s4, %s1805_s30  ;;  %p1809_p0 = scmp.lt.u32.totalorder %s1805_s30, %s2845_s4 }
 0x4fa   :  { %p1811_p1 = pnand %p1809_p0, %p1806_p13 }
 0x4fc   :  { %1814 = shalt.err (!%p1811_p1)
}
 0x4fd   :  { %1606 = dma.vmem_to_hbm [thread:$0]  %s1604_s19, 32, %s2845_s4, [#allocation3]   ;;  %v1209_v23 = vpop.xlane.xlu0 %1208  ;;  %v1556_v4 = vcvt.f32.s32 %v1550_v46  ;;  %vm1559_vm1 = vcmask 1024   ;;  %v1592_v57 = vcvt.f32.s32 %v1586_v62  ;;  %vm1595_vm7 = vcmask 2049  }
 0x4fe   :  { %s1750_s2 = spop %1749  ;;  %s1880_s18 = smov [#allocation7]   ;;  %vm1232_vm9 = vcmask 58368   ;;  %vm1377_vm0 = vcmask 25600  }
 0x4ff   :  { %v1557_v5 = vshll.u32 %v1556_v4, 16  ;;  %v1593_v61 = vshll.u32 %v1592_v57, 16  ;;  %v1216_v18 = vstv %s1750_s2  ;;  %s1633_s19 = sshll.u32 %s1880_s18, 4  ;;  %s1881_s20 = smov [#allocation6]   ;;  %s1634_s19 = int_to_ptr.vmem [resolvable:$true] %s1633_s19 }
 0x500   :  { %v1218_v12 = vadd.f32 %v1216_v18, %v1209_v23  ;;  %s1623_s21 = sshll.u32 %s1881_s20, 4  ;;  %p1820_p3 = scmp.lt.s32.totalorder %s1634_s19, %s1634_s19  ;;  %s2809_s21 = int_to_ptr.vmem [resolvable:$true] %s1623_s21 }
 0x502   :  { %v1225_v36 = vrot.slane %v1218_v12, %v2376_v10 }
 0x512   :  { %v1554_v28 = vpop.xlane.xlu0 %1553 }
 0x513   :  { %v1555_v49 = vcvt.f32.s32 %v1554_v28 }
 0x515   :  { %v1558_v22 = vadd.s32 %v1557_v5, %v1555_v49 }
 0x517   :  { %1560 = vst.msk [vmem:[%s2849_s8] sm:$0x3] %vm1559_vm1, %v1558_v22  ;;  %s1815_s8 = scalar_lea.vmem %s1634_s19, 32 }
 0x518   :  { %p1816_p2 = scmp.ne.s32.totalorder %s1634_s19, %s1815_s8  ;;  %p1821_p4 = scmp.lt.s32.totalorder %s1815_s8, %s1815_s8 }
 0x51a   :  { %p1822_p5 = por %p1821_p4, %p1820_p3 }
 0x51c   :  { %p1823_p6 = pnand %p1822_p5, %p1816_p2 }
 0x557   :  { %v1590_v13 = vpop.xlane.xlu0 %1589 }
 0x558   :  { %v1591_v63 = vcvt.f32.s32 %v1590_v13 }
 0x55a   :  { %v1594_v34 = vadd.s32 %v1593_v61, %v1591_v63 }
 0x55c   :  { %1596 = vst.msk [vmem:[%s2850_s9 - $0x1] sm:$0x6] %vm1595_vm7, %v1594_v34 }
 0x562   :  { %v1212_v37 = vpop.xlane.xlu1 %1211 }
 0x563   :  { %v1219_v53 = vadd.f32 %v1216_v18, %v1212_v37 }
 0x565   :  { %v1229_v6 = vrot.slane %v1219_v53, %v2376_v10 }
 0x566   :  { %v1303_v19 = vpop.permute.xlu1 %1302 }
 0x567   :  { %v1374_v8 = vadd.f32 %v2623_v25, %v1303_v19  ;;  %v1230_v9 = vsel %vm215_vm2, %v1229_v6, %v1225_v36 }
 0x568   :  { %1233 = vst.msk [vmem:[#allocation7] sm:$0x3] %vm1232_vm9, %v1230_v9 }
 0x569   :  { %1378 = vst.msk [vmem:[#allocation6] sm:$0x3] %vm1377_vm0, %v1374_v8 }
 0x56a   :  { %1826 = shalt.err (!%p1823_p6)
}
 0x56b   :  { %s1827_s3 = scalar_lea.hbm %s2848_s7, 32 }
 0x56c   :  { %p1828_p7 = scmp.ne.s32.totalorder %s2848_s7, %s1827_s3  ;;  %p1831_p8 = scmp.lt.u32.totalorder %s1827_s3, %s2848_s7 }
 0x56e   :  { %p1833_p9 = pnand %p1831_p8, %p1828_p7 }
 0x570   :  { %1836 = shalt.err (!%p1833_p9)
}
 0x571   :  { %1636 = dma.vmem_to_hbm [thread:$0]  %s1634_s19, 32, %s2848_s7, [#allocation8]  }
 0x572   :  { %s1837_s0 = scalar_lea.vmem %s2809_s21, 32  ;;  %p1842_p11 = scmp.lt.s32.totalorder %s2809_s21, %s2809_s21 }
 0x573   :  { %p1838_p10 = scmp.ne.s32.totalorder %s2809_s21, %s1837_s0  ;;  %p1843_p12 = scmp.lt.s32.totalorder %s1837_s0, %s1837_s0 }
 0x575   :  { %p1844_p13 = por %p1843_p12, %p1842_p11 }
 0x577   :  { %p1845_p0 = pnand %p1844_p13, %p1838_p10 }
 0x579   :  { %1848 = shalt.err (!%p1845_p0)
}
 0x57a   :  { %s1849_s30 = scalar_lea.hbm %s2847_s6, 32 }
 0x57b   :  { %p1850_p1 = scmp.ne.s32.totalorder %s2847_s6, %s1849_s30  ;;  %p1853_p2 = scmp.lt.u32.totalorder %s1849_s30, %s2847_s6 }
 0x57d   :  { %p1855_p3 = pnand %p1853_p2, %p1850_p1 }
 0x57f   :  { %1858 = shalt.err (!%p1855_p3)
}
 0x580   :  { %1626 = dma.vmem_to_hbm [thread:$0]  %s2809_s21, 32, %s2847_s6, [#allocation5]  }
 0x581   :  { %1859 = dma.done.wait [#allocation3], 32  }
 0x582   :  { %1860 = vsyncadd [#allocation3], 4294967264 }
 0x583   :  { %1861 = dma.done.wait [#allocation5], 64  }
 0x584   :  { %1862 = vsyncadd [#allocation5], 4294967232 }
 0x585   :  { %1863 = dma.done.wait [#allocation8], 32  }
 0x586   :  { %1864 = vsyncadd [#allocation8], 4294967264 }
 0x587   :  { %1657 = vsyncpa [#allocation3], 1 }
 0x588   :  { %1658 = vsyncpa [#allocation5], 1 }
 0x589   :  { %1659 = vsyncpa [#allocation8], 1 }

</bundles_post_ra>
